<compile_context>
chip_gen: v7x
topology: tpu7x:2x2x1
jax: 0.10.0
libtpu: 0.0.40
codegen_flags: <defaults>
</compile_context>

<pallas_src>
import functools

import jax
import jax.numpy as jnp
from jax.experimental import pallas as pl
from jax.experimental.pallas import tpu as pltpu

OBS_SIZE = 32
H1 = 400
H2 = 300
BATCH_TILE = 512  # max batch rows per grid step (256-aligned)


def _round_up(n, m):
    return ((n + m - 1) // m) * m


def _num_tensorcores():
    """Best-effort TensorCore count: v7x packs 2 TCs/chip, earlier gens have 1."""
    try:
        kind = jax.devices()[0].device_kind.lower()
    except Exception:
        return 1
    return 2 if "v7" in kind else 1


def _critic_kernel(x_ref, w1_ref, b1_ref, w2_ref, b2_ref, w3_ref, b3_ref, o_ref):
    # Layer 1: bf16 MXU matmul, f32 accumulation; bias + ReLU on the VPU in f32.
    x = x_ref[...]                                                    # (tile, obs) bf16
    h1 = jnp.dot(x, w1_ref[...], preferred_element_type=jnp.float32) + b1_ref[...]
    h1 = jnp.maximum(h1, 0.0)                                         # (tile, 400) f32

    # Layer 2 (dominant FLOPs): cast activations to bf16 for the MXU, f32 acc.
    h2 = jnp.dot(h1.astype(jnp.bfloat16), w2_ref[...],
                 preferred_element_type=jnp.float32) + b2_ref[...]
    h2 = jnp.maximum(h2, 0.0)                                         # (tile, 300) f32

    # Layer 3 (N=1): VPU multiply + XLU lane-reduce in f32.  Avoids a near-empty
    # single-column MXU pass and any hidden transpose of h2; the (tile, 1) store
    # is only tile*4 bytes per step, so masked stores here are negligible.
    v = jnp.sum(h2 * w3_ref[...], axis=-1, keepdims=True) + b3_ref[0]
    o_ref[...] = v.astype(o_ref.dtype)


@functools.partial(jax.jit, static_argnames=("batch_tile",))
def model_critic_forward(x, params, *, batch_tile=BATCH_TILE):
    """x: (B, obs_size) f32  ->  (B, 1) f32."""
    w1, b1, w2, b2, w3, b3 = params
    B, obs = x.shape

    # ---- tile / grid selection --------------------------------------------
    tile_cap = _round_up(batch_tile, 256)
    num_cores = _num_tensorcores()
    if B > tile_cap:
        tile = tile_cap                          # large batch: big 256-aligned tiles
    elif num_cores <= 1:
        tile = _round_up(max(B, 8), 128)         # single TC: one grid step, 128-aligned
    else:
        # 2 TCs (v7x): split across cores, per-core tile rounded to 256 so MXU
        # M-passes and output lane widths stay full.
        tile = _round_up(max(pl.cdiv(B, num_cores), 8), 256)

    padded_b = _round_up(B, tile)
    if padded_b != B:
        x = jnp.pad(x, ((0, padded_b - B), (0, 0)))
    n_tiles = padded_b // tile

    # bf16 matmul inputs; biases / layer-3 weights stay f32.
    x_bf = x.astype(jnp.bfloat16)
    w1_bf = w1.astype(jnp.bfloat16)
    w2_bf = w2.astype(jnp.bfloat16)
    w3_row = w3.reshape(1, -1)                   # (1, H2) f32 for the VPU mul+reduce
    b3_s = b3.reshape(1)                         # scalar bias -> SMEM

    full2 = lambda a: pl.BlockSpec(a.shape, lambda i: (0, 0))

    out = pl.pallas_call(
        _critic_kernel,
        out_shape=jax.ShapeDtypeStruct((padded_b, 1), jnp.float32),
        grid_spec=pltpu.PrefetchScalarGridSpec(
            num_scalar_prefetch=0,
            grid=(n_tiles,),
            in_specs=[
                pl.BlockSpec((tile, obs), lambda i: (i, 0)),        # x batch tile
                full2(w1_bf), full2(b1),                            # layer 1 (VMEM-resident)
                full2(w2_bf), full2(b2),                            # layer 2 (VMEM-resident)
                full2(w3_row),                                      # layer 3 weight row
                pl.BlockSpec(memory_space=pltpu.MemorySpace.SMEM),  # layer 3 bias scalar
            ],
            out_specs=pl.BlockSpec((tile, 1), lambda i: (i, 0)),
        ),
        compiler_params=pltpu.CompilerParams(
            dimension_semantics=("parallel",),
        ),
    )(x_bf, w1_bf, b1, w2_bf, b2, w3_row, b3_s)

    return out[:B]


def init_params(key, obs_size=OBS_SIZE):
    """Deterministic init mimicking torch.nn.Linear default U[-1/sqrt(fan_in), +]."""
    ks = jax.random.split(key, 6)

    def linear(kw, kb, fan_in, fan_out):
        bound = 1.0 / jnp.sqrt(fan_in)
        w = jax.random.uniform(kw, (fan_in, fan_out), jnp.float32, -bound, bound)
        b = jax.random.uniform(kb, (1, fan_out), jnp.float32, -bound, bound)
        return w, b

    w1, b1 = linear(ks[0], ks[1], obs_size, H1)
    w2, b2 = linear(ks[2], ks[3], H1, H2)
    w3, b3 = linear(ks[4], ks[5], H2, 1)
    return (w1, b1, w2, b2, w3, b3)


def reference_forward(x, params):
    w1, b1, w2, b2, w3, b3 = params
    h1 = jnp.maximum(x @ w1 + b1, 0.0)
    h2 = jnp.maximum(h1 @ w2 + b2, 0.0)
    return h2 @ w3 + b3


if __name__ == "__main__":
    key = jax.random.PRNGKey(0)
    k_params, k_x = jax.random.split(key)

    params = init_params(k_params, OBS_SIZE)
    batch = 4  # small, non-tile-multiple: exercises the padding path
    x = jax.random.normal(k_x, (batch, OBS_SIZE), jnp.float32)

    out = jax.block_until_ready(model_critic_forward(x, params))

    ref = reference_forward(x, params)
    assert out.shape == (batch, 1), out.shape
    # bf16 MXU inputs -> loosen tolerance vs. the pure-f32 reference.
    assert jnp.allclose(out, ref, atol=2e-2, rtol=2e-2), "mismatch vs JAX reference"

    print("KERNEL_OK")
</pallas_src>

<mosaic_0001>
module attributes {stable_mosaic.version = 11 : i64} {
  func.func @_critic_kernel(%arg0: i32, %arg1: memref<128x32xbf16, #tpu.memory_space<vmem>>, %arg2: memref<32x400xbf16, #tpu.memory_space<vmem>>, %arg3: memref<1x400xf32, #tpu.memory_space<vmem>>, %arg4: memref<400x300xbf16, #tpu.memory_space<vmem>>, %arg5: memref<1x300xf32, #tpu.memory_space<vmem>>, %arg6: memref<1x300xf32, #tpu.memory_space<vmem>>, %arg7: memref<1xf32, #tpu.memory_space<smem>>, %arg8: memref<128x1xf32, #tpu.memory_space<vmem>>) attributes {dimension_semantics = [#tpu.dimension_semantics<parallel>], iteration_bounds = array<i64: 1>, scalar_prefetch = 0 : i64, scratch_operands = 0 : i64, tpu.core_type = #tpu.core_type<tc>, window_params = [{transform_indices = @transform_0, window_bounds = array<i64: 128, 32>}, {pipeline_mode = #tpu.pipeline_mode<synchronous>, transform_indices = @transform_1, window_bounds = array<i64: 32, 400>}, {pipeline_mode = #tpu.pipeline_mode<synchronous>, transform_indices = @transform_2, window_bounds = array<i64: 1, 400>}, {pipeline_mode = #tpu.pipeline_mode<synchronous>, transform_indices = @transform_3, window_bounds = array<i64: 400, 300>}, {pipeline_mode = #tpu.pipeline_mode<synchronous>, transform_indices = @transform_4, window_bounds = array<i64: 1, 300>}, {pipeline_mode = #tpu.pipeline_mode<synchronous>, transform_indices = @transform_5, window_bounds = array<i64: 1, 300>}, {transform_indices = @transform_6, window_bounds = array<i64: 1>}, {transform_indices = @transform_7, window_bounds = array<i64: 128, 1>}]} {
    %c0 = arith.constant 0 : index
    %c0_0 = arith.constant 0 : index
    %0 = vector.load %arg1[%c0, %c0_0] : memref<128x32xbf16, #tpu.memory_space<vmem>>, vector<128x32xbf16>
    %c0_1 = arith.constant 0 : index
    %c0_2 = arith.constant 0 : index
    %1 = vector.load %arg2[%c0_1, %c0_2] : memref<32x400xbf16, #tpu.memory_space<vmem>>, vector<32x400xbf16>
    %cst = arith.constant dense<0.000000e+00> : vector<128x400xf32>
    %2 = tpu.matmul %0, %1, %cst {dimension_numbers = #tpu.dot_dimension_numbers<[1], [0], [0], [1], [0, 0, 1, 1], [], []>} : vector<128x32xbf16>, vector<32x400xbf16>, vector<128x400xf32> -> vector<128x400xf32>
    %c0_3 = arith.constant 0 : index
    %c0_4 = arith.constant 0 : index
    %3 = vector.load %arg3[%c0_3, %c0_4] : memref<1x400xf32, #tpu.memory_space<vmem>>, vector<1x400xf32>
    %4 = vector.broadcast %3 : vector<1x400xf32> to vector<128x400xf32>
    %5 = arith.addf %2, %4 : vector<128x400xf32>
    %cst_5 = arith.constant 0.000000e+00 : f32
    %6 = vector.broadcast %cst_5 : f32 to vector<128x400xf32>
    %7 = arith.maximumf %5, %6 : vector<128x400xf32>
    %8 = arith.truncf %7 : vector<128x400xf32> to vector<128x400xbf16>
    %c0_6 = arith.constant 0 : index
    %c0_7 = arith.constant 0 : index
    %9 = vector.load %arg4[%c0_6, %c0_7] : memref<400x300xbf16, #tpu.memory_space<vmem>>, vector<400x300xbf16>
    %cst_8 = arith.constant dense<0.000000e+00> : vector<128x300xf32>
    %10 = tpu.matmul %8, %9, %cst_8 {dimension_numbers = #tpu.dot_dimension_numbers<[1], [0], [0], [1], [0, 0, 1, 1], [], []>} : vector<128x400xbf16>, vector<400x300xbf16>, vector<128x300xf32> -> vector<128x300xf32>
    %c0_9 = arith.constant 0 : index
    %c0_10 = arith.constant 0 : index
    %11 = vector.load %arg5[%c0_9, %c0_10] : memref<1x300xf32, #tpu.memory_space<vmem>>, vector<1x300xf32>
    %12 = vector.broadcast %11 : vector<1x300xf32> to vector<128x300xf32>
    %13 = arith.addf %10, %12 : vector<128x300xf32>
    %cst_11 = arith.constant 0.000000e+00 : f32
    %14 = vector.broadcast %cst_11 : f32 to vector<128x300xf32>
    %15 = arith.maximumf %13, %14 : vector<128x300xf32>
    %c0_12 = arith.constant 0 : index
    %c0_13 = arith.constant 0 : index
    %16 = vector.load %arg6[%c0_12, %c0_13] : memref<1x300xf32, #tpu.memory_space<vmem>>, vector<1x300xf32>
    %17 = vector.broadcast %16 : vector<1x300xf32> to vector<128x300xf32>
    %18 = arith.mulf %15, %17 : vector<128x300xf32>
    %cst_14 = arith.constant dense<0.000000e+00> : vector<128xf32>
    %19 = vector.multi_reduction <add>, %18, %cst_14 [1] : vector<128x300xf32> to vector<128xf32>
    %20 = vector.shape_cast %19 : vector<128xf32> to vector<128x1xf32>
    %c0_15 = arith.constant 0 : index
    %21 = memref.load %arg7[%c0_15] : memref<1xf32, #tpu.memory_space<smem>>
    %22 = vector.broadcast %21 : f32 to vector<128x1xf32>
    %23 = arith.addf %20, %22 : vector<128x1xf32>
    %c0_16 = arith.constant 0 : index
    %c0_17 = arith.constant 0 : index
    %24 = vector.load %arg8[%c0_16, %c0_17] : memref<128x1xf32, #tpu.memory_space<vmem>>, vector<128x1xf32>
    tpu.vector_store %arg8[%c0_16, %c0_17], %23 {strides = array<i32>} : memref<128x1xf32, #tpu.memory_space<vmem>>, vector<128x1xf32>,
    return
  }
  func.func @transform_0(%arg0: i32) -> (i32, i32) {
    %c0_i32 = arith.constant 0 : i32
    %c0_i32_0 = arith.constant 0 : i32
    return %arg0, %c0_i32 : i32, i32
  }
  func.func @transform_1(%arg0: i32) -> (i32, i32) {
    %c0_i32 = arith.constant 0 : i32
    %c0_i32_0 = arith.constant 0 : i32
    %c0_i32_1 = arith.constant 0 : i32
    return %c0_i32, %c0_i32_0 : i32, i32
  }
  func.func @transform_2(%arg0: i32) -> (i32, i32) {
    %c0_i32 = arith.constant 0 : i32
    %c0_i32_0 = arith.constant 0 : i32
    %c0_i32_1 = arith.constant 0 : i32
    return %c0_i32, %c0_i32_0 : i32, i32
  }
  func.func @transform_3(%arg0: i32) -> (i32, i32) {
    %c0_i32 = arith.constant 0 : i32
    %c0_i32_0 = arith.constant 0 : i32
    %c0_i32_1 = arith.constant 0 : i32
    return %c0_i32, %c0_i32_0 : i32, i32
  }
  func.func @transform_4(%arg0: i32) -> (i32, i32) {
    %c0_i32 = arith.constant 0 : i32
    %c0_i32_0 = arith.constant 0 : i32
    %c0_i32_1 = arith.constant 0 : i32
    return %c0_i32, %c0_i32_0 : i32, i32
  }
  func.func @transform_5(%arg0: i32) -> (i32, i32) {
    %c0_i32 = arith.constant 0 : i32
    %c0_i32_0 = arith.constant 0 : i32
    %c0_i32_1 = arith.constant 0 : i32
    return %c0_i32, %c0_i32_0 : i32, i32
  }
  func.func @transform_6(%arg0: i32) -> i32 {
    %c0_i32 = arith.constant 0 : i32
    %c0_i32_0 = arith.constant 0 : i32
    return %c0_i32 : i32
  }
  func.func @transform_7(%arg0: i32) -> (i32, i32) {
    %c0_i32 = arith.constant 0 : i32
    %c0_i32_0 = arith.constant 0 : i32
    return %arg0, %c0_i32 : i32, i32
  }
}

</mosaic_0001>

<bundles_post_ra>
// kernel: model_critic_forward.1
= control target key start
LH: loop header
LB: loop body
LE: loop exit
PB: predicated region body
PF: predicated region fallthrough
CT: control target
= control target key end

     0   :  { %v2068_v1 = vmov 0   ;;  %vm154_vm0 = vcmask 261120   ;;  %vm1018_vm1 = vcmask 130048   ;;  %vm1577_vm2 = vcmask 359424   ;;  %s2816_s1 = inlined_call_operand.vmem [shape: bf16[32,400], index: 1, kind: input, shape index: {}]   ;;  %s2817_s0 = inlined_call_operand.vmem [shape: bf16[128,32], index: 0, kind: input, shape index: {}]   ;;  %s2818_s3 = inlined_call_operand.vmem [shape: bf16[400,300], index: 3, kind: input, shape index: {}]   ;;  %s2819_s2 = inlined_call_operand.vmem [shape: f32[1,400], index: 2, kind: input, shape index: {}]   ;;  %s2820_s4 = inlined_call_operand.vmem [shape: f32[1,300], index: 4, kind: input, shape index: {}]   ;;  %s2821_s5 = inlined_call_operand.vmem [shape: f32[1,300], index: 5, kind: input, shape index: {}]   ;;  %s2822_s6 = inlined_call_operand.<no memory space> [shape: f32[1], index: 6, kind: input, shape index: {}]   ;;  %s2823_s7 = inlined_call_operand.vmem [shape: f32[128,1], index: 7, kind: output, shape index: {}]  }
   0x1   :  { %v1948_v0 = vld [vmem:[%s2816_s1 + $0x4] ss:$16 sps:$4 sm:$0xff]   ;;  %211 = vmatprep.mubr.bf16.mxu0 %v2068_v1  ;;  %324 = vmatprep.mubr.bf16.mxu1 %v2068_v1  ;;  %v1950_v2 = vld [vmem:[%s2816_s1] ss:$16 sps:$4 sm:$0xff]   ;;  %v1961_v6 = vld [vmem:[%s2816_s1 + $0xc] ss:$16 sps:$4 sm:$0xff]  }
   0x2   :  { %179 = vmatprep.subr.bf16.mxu0 %v1948_v0  ;;  %v1951_v3 = vld [vmem:[%s2816_s1 + $0x24] ss:$16 sps:$4 sm:$0xff]   ;;  %v1953_v4 = vld [vmem:[%s2816_s1 + $0x20] ss:$16 sps:$4 sm:$0xff]   ;;  %v1963_v7 = vld [vmem:[%s2816_s1 + $0x8] ss:$16 sps:$4 sm:$0xff]   ;;  %292 = vmatprep.subr.bf16.mxu1 %v1961_v6 }
   0x3   :  { %180 = vmatpush1.bf16.msra.mxu0 %v1950_v2  ;;  %v1954_v5 = vld [vmem:[%s2817_s0] sm:$0xff]   ;;  %v1955_v8 = vld [vmem:[%s2817_s0 + $0x8] sm:$0xff]   ;;  %293 = vmatpush1.bf16.msra.mxu1 %v1963_v7  ;;  %v1956_v20 = vld [vmem:[%s2817_s0 + $0x10] sm:$0xff]   ;;  %vm1675_vm3 = vcmask 7168  }
   0x4   :  { %181 = vmatprep.subr.bf16.mxu0 %v1951_v3  ;;  %v1965_v9 = vld [vmem:[%s2816_s1 + $0x2c] ss:$16 sps:$4 sm:$0xff]   ;;  %v1967_v10 = vld [vmem:[%s2816_s1 + $0x28] ss:$16 sps:$4 sm:$0xff]   ;;  %v1970_v12 = vld [vmem:[%s2818_s3 + $0x4] ss:$12 sps:$4 sm:$0xff]   ;;  %v54_v3 = vlaneseq }
   0x5   :  { %294 = vmatprep.subr.bf16.mxu1 %v1965_v9  ;;  %v1968_v11 = vld [vmem:[%s2818_s3] ss:$12 sps:$4 sm:$0xff]   ;;  %v1971_v13 = vld [vmem:[%s2818_s3 + $0xc8] ss:$12 sps:$4 sm:$0xff]   ;;  %v1973_v16 = vld [vmem:[%s2818_s3 + $0x18] ss:$12 sps:$4 sm:$0xff]  }
   0x6   :  { %v1972_v14 = vld [vmem:[%s2818_s3 + $0x8] ss:$12 sps:$4 sm:$0xff]   ;;  %v1979_v18 = vld [vmem:[%s2818_s3 + $0xe0] ss:$12 sps:$4 sm:$0xff]   ;;  %v1976_v21 = vld [vmem:[%s2818_s3 + $0x30] ss:$12 sps:$4 sm:$0xff]  }
   0x7   :  { %182 = vmatpush1.bf16.msra.mxu0 %v1953_v4  ;;  %295 = vmatpush1.bf16.msra.mxu1 %v1967_v10  ;;  %v1975_v15 = vld [vmem:[%s2818_s3 + $0x1c] ss:$12 sps:$4 sm:$0xff]   ;;  %v1978_v17 = vld [vmem:[%s2818_s3 + $0x34] ss:$12 sps:$4 sm:$0xff]   ;;  %v1983_v22 = vld [vmem:[%s2818_s3 + $0x4c] ss:$12 sps:$4 sm:$0xff]  }
   0x8   :  { %1043 = vmatprep.subr.bf16.mxu0 %v1970_v12  ;;  %1819 = vmatprep.subr.bf16.mxu1 %v1971_v13  ;;  %v1980_v19 = vld [vmem:[%s2818_s3 + $0x20] ss:$12 sps:$4 sm:$0xff]   ;;  %v1987_v23 = vld [vmem:[%s2818_s3 + $0xf8] ss:$12 sps:$4 sm:$0xff]   ;;  %v1981_v25 = vld [vmem:[%s2818_s3 + $0x48] ss:$12 sps:$4 sm:$0xff]  }
   0x9   :  { %v1988_v24 = vld [vmem:[%s2818_s3 + $0x38] ss:$12 sps:$4 sm:$0xff]   ;;  %v1995_v28 = vld [vmem:[%s2818_s3 + $0x110] ss:$12 sps:$4 sm:$0xff]   ;;  %v1984_v30 = vld [vmem:[%s2818_s3 + $0x60] ss:$12 sps:$4 sm:$0xff]  }
   0xa   :  { %1712 = vmatmul.mubr.msk.bf16.vlgmr.msra.gmra.mrb[0].mxu0 %vm154_vm0, %v1954_v5  ;;  %1720 = vmatmul.mubr.msk.bf16.vlgmr.msra.gmra.mrb[0].mxu1 %vm154_vm0, %v1954_v5  ;;  %v1957_v26 = vld [vmem:[%s2817_s0 + $0x18] sm:$0xff]   ;;  %v1986_v27 = vld [vmem:[%s2818_s3 + $0x64] ss:$12 sps:$4 sm:$0xff]   ;;  %v2003_v33 = vld [vmem:[%s2818_s3 + $0x128] ss:$12 sps:$4 sm:$0xff]   ;;  %v55_v4 = vshrl.u32 %v54_v3, 7 }
   0xb   :  { %221 = vmatprep.mubr.bf16.mxu0 %v2068_v1  ;;  %1044 = vmatpush1.bf16.msra.mxu0 %v1968_v11  ;;  %v1996_v29 = vld [vmem:[%s2818_s3 + $0x50] ss:$12 sps:$4 sm:$0xff]   ;;  %v1989_v32 = vld [vmem:[%s2818_s3 + $0x78] ss:$12 sps:$4 sm:$0xff]   ;;  %v2004_v34 = vld [vmem:[%s2818_s3 + $0x68] ss:$12 sps:$4 sm:$0xff]  }
   0xc   :  { %1045 = vmatprep.subr.bf16.mxu0 %v1975_v15  ;;  %334 = vmatprep.mubr.bf16.mxu1 %v2068_v1  ;;  %v1991_v31 = vld [vmem:[%s2818_s3 + $0x7c] ss:$12 sps:$4 sm:$0xff]   ;;  %v1994_v35 = vld [vmem:[%s2818_s3 + $0x94] ss:$12 sps:$4 sm:$0xff]   ;;  %v1999_v40 = vld [vmem:[%s2818_s3 + $0xac] ss:$12 sps:$4 sm:$0xff]  }
   0xd   :  { %1820 = vmatpush3.bf16.msra.mxu1 %v1972_v14  ;;  %v1958_v36 = vld [vmem:[%s2817_s0 + $0x20] sm:$0xff]   ;;  %v1992_v37 = vld [vmem:[%s2818_s3 + $0x90] ss:$12 sps:$4 sm:$0xff]   ;;  %v1997_v41 = vld [vmem:[%s2818_s3 + $0xa8] ss:$12 sps:$4 sm:$0xff]   ;;  %v2337_v5 = vsub.s32 0, %v55_v4 }
   0xe   :  { %1821 = vmatprep.subr.bf16.mxu1 %v1979_v18  ;;  %v2011_v38 = vld [vmem:[%s2818_s3 + $0x140] ss:$12 sps:$4 sm:$0xff]   ;;  %v2002_v42 = vld [vmem:[%s2818_s3 + $0xc4] ss:$12 sps:$4 sm:$0xff]   ;;  %v2007_v47 = vld [vmem:[%s2818_s3 + $0xdc] ss:$12 sps:$4 sm:$0xff]  }
   0xf   :  { %1046 = vmatpush1.bf16.msra.mxu0 %v1973_v16  ;;  %v2012_v39 = vld [vmem:[%s2818_s3 + $0x80] ss:$12 sps:$4 sm:$0xff]   ;;  %v2019_v43 = vld [vmem:[%s2818_s3 + $0x158] ss:$12 sps:$4 sm:$0xff]   ;;  %v1960_v50 = vld [vmem:[%s2817_s0 + $0x30] sm:$0xff]   ;;  %v2342_v7 = vsub.s32 1, %v55_v4 }
  0x10   :  { %1047 = vmatprep.subr.bf16.mxu0 %v1978_v17  ;;  %v2020_v44 = vld [vmem:[%s2818_s3 + $0x98] ss:$12 sps:$4 sm:$0xff]   ;;  %v1959_v45 = vld [vmem:[%s2817_s0 + $0x28] sm:$0xff]   ;;  %v2010_v49 = vld [vmem:[%s2818_s3 + $0xf4] ss:$12 sps:$4 sm:$0xff]   ;;  %v2353_v17 = vsub.s32 2, %v55_v4 }
  0x11   :  { %1822 = vmatpush3.bf16.msra.mxu1 %v1980_v19  ;;  %v2000_v46 = vld [vmem:[%s2818_s3 + $0xc0] ss:$12 sps:$4 sm:$0xff]   ;;  %v2005_v48 = vld [vmem:[%s2818_s3 + $0xd8] ss:$12 sps:$4 sm:$0xff]   ;;  %v2008_v51 = vld [vmem:[%s2818_s3 + $0xf0] ss:$12 sps:$4 sm:$0xff]  }
  0x12   :  { %1713 = vmatmul.mubr.msk.bf16.gmra.mrb[4].mxu0 %vm154_vm0, %v1955_v8  ;;  %1823 = vmatprep.subr.bf16.mxu1 %v1987_v23  ;;  %v2015_v52 = vld [vmem:[%s2818_s3 + $0x10c] ss:$12 sps:$4 sm:$0xff]   ;;  %v2013_v53 = vld [vmem:[%s2818_s3 + $0x108] ss:$12 sps:$4 sm:$0xff]   ;;  %v2018_v54 = vld [vmem:[%s2818_s3 + $0x124] ss:$12 sps:$4 sm:$0xff]  }
  0x13   :  { %231 = vmatprep.mubr.bf16.mxu0 %v2068_v1  ;;  %1048 = vmatpush1.bf16.msra.mxu0 %v1976_v21  ;;  %v1964_v55 = vld [vmem:[%s2817_s0 + $0x38] sm:$0xff]   ;;  %v2016_v56 = vld [vmem:[%s2818_s3 + $0x120] ss:$12 sps:$4 sm:$0xff]   ;;  %v2029_v0 = vld [vmem:[%s2818_s3 + $0x168] ss:$12 sps:$4 sm:$0xff]   ;;  %v68_v19 = vsub.s32 3, %v55_v4 }
  0x14   :  { %1721 = vmatmul.mubr.msk.bf16.gmra.mrb[4].mxu1 %vm154_vm0, %v1955_v8  ;;  %1049 = vmatprep.subr.bf16.mxu0 %v1983_v22  ;;  %v2023_v57 = vld [vmem:[%s2818_s3 + $0x13c] ss:$12 sps:$4 sm:$0xff]   ;;  %v2021_v58 = vld [vmem:[%s2818_s3 + $0x138] ss:$12 sps:$4 sm:$0xff]   ;;  %v2026_v59 = vld [vmem:[%s2818_s3 + $0x154] ss:$12 sps:$4 sm:$0xff]  }
  0x15   :  { %344 = vmatprep.mubr.bf16.mxu1 %v2068_v1  ;;  %1824 = vmatpush3.bf16.msra.mxu1 %v1988_v24  ;;  %v2024_v60 = vld [vmem:[%s2818_s3 + $0x150] ss:$12 sps:$4 sm:$0xff]   ;;  %v2031_v62 = vld [vmem:[%s2818_s3 + $0x16c] ss:$12 sps:$4 sm:$0xff]   ;;  %v52_v6 = vld [vmem:[%s2819_s2] sm:$0xf] }
  0x16   :  { %1825 = vmatprep.subr.bf16.mxu1 %v1995_v28  ;;  %v2027_v61 = vld [vmem:[%s2818_s3 + $0x170] ss:$12 sps:$4 sm:$0xff]   ;;  %v2345_v8 = vrot.slane %v52_v6, %v2337_v5  ;;  %v2348_v9 = vrot.slane %v52_v6, %v2342_v7  ;;  %v2032_v28 = vld [vmem:[%s2818_s3 + $0x180] ss:$12 sps:$4 sm:$0xff]  }
  0x17   :  { %1050 = vmatpush1.bf16.msra.mxu0 %v1981_v25  ;;  %v2028_v63 = vld [vmem:[%s2818_s3 + $0xb0] ss:$12 sps:$4 sm:$0xff]   ;;  %v2357_v25 = vrot.slane %v52_v6, %v2353_v17 }
  0x18   :  { %1051 = vmatprep.subr.bf16.mxu0 %v1986_v27  ;;  %v2034_v2 = vld [vmem:[%s2818_s3 + $0x184] ss:$12 sps:$4 sm:$0xff]  }
  0x19   :  { %1826 = vmatpush3.bf16.msra.mxu1 %v1996_v29  ;;  %v2035_v29 = vld [vmem:[%s2818_s3 + $0x188] ss:$12 sps:$4 sm:$0xff]  }
  0x1a   :  { %1714 = vmatmul.mubr.msk.bf16.gmra.mrb[8].mxu0 %vm154_vm0, %v1956_v20  ;;  %1827 = vmatprep.subr.bf16.mxu1 %v2003_v33  ;;  %v2038_v33 = vld [vmem:[%s2818_s3 + $0x19c] ss:$12 sps:$4 sm:$0xff]  }
  0x1b   :  { %241 = vmatprep.mubr.bf16.mxu0 %v2068_v1  ;;  %1052 = vmatpush1.bf16.msra.mxu0 %v1984_v30  ;;  %v2365_v30 = vrot.slane %v52_v6, %v68_v19  ;;  %v2047_v19 = vld [vmem:[%s2818_s3 + $0x1d0] ss:$12 sps:$4 sm:$0xff]  }
  0x1c   :  { %1722 = vmatmul.mubr.msk.bf16.gmra.mrb[8].mxu1 %vm154_vm0, %v1956_v20  ;;  %1053 = vmatprep.subr.bf16.mxu0 %v1991_v31 }
  0x1d   :  { %354 = vmatprep.mubr.bf16.mxu1 %v2068_v1  ;;  %1828 = vmatpush3.bf16.msra.mxu1 %v2004_v34 }
  0x1e   :  { %1829 = vmatprep.subr.bf16.mxu1 %v2011_v38 }
  0x1f   :  { %1054 = vmatpush1.bf16.msra.mxu0 %v1989_v32 }
  0x20   :  { %1055 = vmatprep.subr.bf16.mxu0 %v1994_v35 }
  0x21   :  { %1830 = vmatpush3.bf16.msra.mxu1 %v2012_v39 }
  0x22   :  { %1715 = vmatmul.mubr.msk.bf16.gmra.mrb[12].mxu0 %vm154_vm0, %v1957_v26  ;;  %1831 = vmatprep.subr.bf16.mxu1 %v2019_v43  ;;  %v2039_v43 = vld [vmem:[%s2818_s3 + $0x1a0] ss:$12 sps:$4 sm:$0xff]  }
  0x23   :  { %251 = vmatprep.mubr.bf16.mxu0 %v2068_v1  ;;  %1056 = vmatpush1.bf16.msra.mxu0 %v1992_v37 }
  0x24   :  { %1723 = vmatmul.mubr.msk.bf16.gmra.mrb[12].mxu1 %vm154_vm0, %v1957_v26  ;;  %1057 = vmatprep.subr.bf16.mxu0 %v1999_v40 }
  0x25   :  { %364 = vmatprep.mubr.bf16.mxu1 %v2068_v1  ;;  %1832 = vmatpush3.bf16.msra.mxu1 %v2020_v44 }
  0x26   :  { %1833 = vmatprep.subr.bf16.mxu1 %v2027_v61  ;;  %v2043_v61 = vld [vmem:[%s2818_s3 + $0x1b8] ss:$12 sps:$4 sm:$0xff]  }
  0x27   :  { %1058 = vmatpush1.bf16.msra.mxu0 %v1997_v41 }
  0x28   :  { %1059 = vmatprep.subr.bf16.mxu0 %v2002_v42  ;;  %v2036_v42 = vld [vmem:[%s2818_s3 + $0x198] ss:$12 sps:$4 sm:$0xff]  }
  0x29   :  { %1834 = vmatpush3.bf16.msra.mxu1 %v2028_v63 }
  0x2a   :  { %1716 = vmatmul.mubr.msk.bf16.gmra.mrb[16].mxu0 %vm154_vm0, %v1958_v36  ;;  %1366 = vmatprep.subr.bf16.mxu1 %v2068_v1 }
  0x2b   :  { %261 = vmatprep.mubr.bf16.mxu0 %v2068_v1  ;;  %1060 = vmatpush1.bf16.msra.mxu0 %v2000_v46 }
  0x2c   :  { %1724 = vmatmul.mubr.msk.bf16.gmra.mrb[16].mxu1 %vm154_vm0, %v1958_v36  ;;  %1061 = vmatprep.subr.bf16.mxu0 %v2007_v47 }
  0x2d   :  { %374 = vmatprep.mubr.bf16.mxu1 %v2068_v1 }
  0x2f   :  { %1062 = vmatpush1.bf16.msra.mxu0 %v2005_v48  ;;  %v2042_v48 = vld [vmem:[%s2818_s3 + $0x1b4] ss:$12 sps:$4 sm:$0xff]  }
  0x30   :  { %1063 = vmatprep.subr.bf16.mxu0 %v2010_v49 }
  0x32   :  { %1717 = vmatmul.mubr.msk.bf16.gmra.mrb[20].mxu0 %vm154_vm0, %v1959_v45 }
  0x33   :  { %271 = vmatprep.mubr.bf16.mxu0 %v2068_v1  ;;  %1064 = vmatpush1.bf16.msra.mxu0 %v2008_v51 }
  0x34   :  { %1725 = vmatmul.mubr.msk.bf16.gmra.mrb[20].mxu1 %vm154_vm0, %v1959_v45  ;;  %1065 = vmatprep.subr.bf16.mxu0 %v2015_v52 }
  0x35   :  { %384 = vmatprep.mubr.bf16.mxu1 %v2068_v1 }
  0x37   :  { %1066 = vmatpush1.bf16.msra.mxu0 %v2013_v53 }
  0x38   :  { %1067 = vmatprep.subr.bf16.mxu0 %v2018_v54 }
  0x3a   :  { %1718 = vmatmul.mubr.msk.bf16.gmra.mrb[24].mxu0 %vm154_vm0, %v1960_v50 }
  0x3b   :  { %281 = vmatprep.mubr.bf16.mxu0 %v2068_v1  ;;  %1068 = vmatpush1.bf16.msra.mxu0 %v2016_v56 }
  0x3c   :  { %1726 = vmatmul.mubr.msk.bf16.gmra.mrb[24].mxu1 %vm154_vm0, %v1960_v50  ;;  %1069 = vmatprep.subr.bf16.mxu0 %v2023_v57 }
  0x3d   :  { %394 = vmatprep.mubr.bf16.mxu1 %v2068_v1 }
  0x3f   :  { %1070 = vmatpush1.bf16.msra.mxu0 %v2021_v58 }
  0x40   :  { %1071 = vmatprep.subr.bf16.mxu0 %v2026_v59 }
  0x42   :  { %1719 = vmatmul.mubr.msk.bf16.gmra.mrb[28].mxu0 %vm154_vm0, %v1964_v55 }
  0x43   :  { %1072 = vmatpush1.bf16.msra.mxu0 %v2024_v60  ;;  %v2040_v60 = vld [vmem:[%s2818_s3 + $0x1b0] ss:$12 sps:$4 sm:$0xff]  }
  0x44   :  { %1727 = vmatmul.mubr.msk.bf16.gmra.mrb[28].mxu1 %vm154_vm0, %v1964_v55  ;;  %1073 = vmatprep.subr.bf16.mxu0 %v2031_v62 }
  0x47   :  { %1074 = vmatpush1.bf16.msra.mxu0 %v2029_v0 }
  0x48   :  { %1156 = vmatprep.subr.bf16.mxu0 %v2034_v2  ;;  %v2046_v2 = vld [vmem:[%s2818_s3 + $0x1cc] ss:$12 sps:$4 sm:$0xff]  }
  0xdd   :  { %v213_v10 = vpop.f32.mrb[0].mxu0  ;;  %v326_v36 = vpop.f32.mrb[0].mxu1 }
  0xde   :  { %v214_v11 = vadd.f32 %v213_v10, %v2345_v8  ;;  %v215_v12 = vpop.f32.mrb[1].mxu0  ;;  %v327_v39 = vadd.f32 %v326_v36, %v2357_v25  ;;  %v328_v40 = vpop.f32.mrb[1].mxu1 }
  0xdf   :  { %v216_v13 = vadd.f32 %v215_v12, %v2348_v9  ;;  %v217_v14 = vpop.f32.mrb[2].mxu0  ;;  %v329_v44 = vadd.f32 %v328_v40, %v2365_v30  ;;  %v330_v45 = vpop.f32.mrb[2].mxu1 }
  0xe0   :  { %v218_v15 = vadd.f32 %v217_v14, %v2345_v8  ;;  %v219_v16 = vpop.f32.mrb[3].mxu0  ;;  %v405_v20 = vmax.f32 %v214_v11, 0.0  ;;  %v407_v49 = vmax.f32 %v327_v39, 0.0  ;;  %v331_v50 = vadd.f32 %v330_v45, %v2357_v25  ;;  %v332_v51 = vpop.f32.mrb[3].mxu1  ;;  %v2051_v39 = vld [vmem:[%s2818_s3 + $0x1e8] ss:$12 sps:$4 sm:$0xff]  }
  0xe1   :  { %v220_v18 = vadd.f32 %v219_v16, %v2348_v9  ;;  %v406_v22 = vmax.f32 %v216_v13, 0.0  ;;  %v408_v54 = vmax.f32 %v329_v44, 0.0  ;;  %v333_v55 = vadd.f32 %v332_v51, %v2365_v30 }
  0xe2   :  { %v409_v21 = vmax.f32 %v218_v15, 0.0  ;;  %v411_v57 = vmax.f32 %v331_v50, 0.0 }
  0xe3   :  { %v410_v23 = vmax.f32 %v220_v18, 0.0  ;;  %v412_v62 = vmax.f32 %v333_v55, 0.0  ;;  %v2044_v18 = vld [vmem:[%s2818_s3 + $0x1c8] ss:$12 sps:$4 sm:$0xff]   ;;  %v2055_v55 = vld [vmem:[%s2818_s3 + $0x200] ss:$12 sps:$4 sm:$0xff]  }
  0xe4   :  { %v469_v24 = vpack.c.bf16 %v409_v21, %v405_v20  ;;  %v2399_v3 = vpack.c.bf16 %v411_v57, %v407_v49 }
  0xe5   :  { %v470_v26 = vpack.c.bf16 %v410_v23, %v406_v22  ;;  %v223_v27 = vpop.f32.mrb[4].mxu0  ;;  %v2402_v10 = vpack.c.bf16 %v412_v62, %v408_v54  ;;  %v2052_v54 = vld [vmem:[%s2818_s3 + $0x1f8] ss:$12 sps:$4 sm:$0xff]  }
  0xe6   :  { %v224_v31 = vadd.f32 %v223_v27, %v2345_v8  ;;  %v225_v32 = vpop.f32.mrb[5].mxu0 }
  0xe7   :  { %v226_v34 = vadd.f32 %v225_v32, %v2348_v9  ;;  %v227_v35 = vpop.f32.mrb[6].mxu0  ;;  %1075 = vmatprep.mubr.bf16.mxu0 %v470_v26  ;;  %1301 = vmatprep.mubr.bf16.mxu1 %v470_v26  ;;  %v336_v11 = vpop.f32.mrb[4].mxu1 }
  0xe8   :  { %v228_v37 = vadd.f32 %v227_v35, %v2345_v8  ;;  %v229_v38 = vpop.f32.mrb[7].mxu0  ;;  %1076 = vmatmul.mubr.bf16.vlgmr.msra.gmra.mrb[32].mxu0 %v469_v24  ;;  %1302 = vmatmul.mubr.bf16.vlgmr.msra.gmra.mrb[32].mxu1 %v469_v24  ;;  %v413_v46 = vmax.f32 %v224_v31, 0.0  ;;  %v337_v14 = vadd.f32 %v336_v11, %v2357_v25  ;;  %v338_v15 = vpop.f32.mrb[5].mxu1  ;;  %v2050_v24 = vld [vmem:[%s2818_s3 + $0x1e4] ss:$12 sps:$4 sm:$0xff]  }
  0xe9   :  { %v230_v41 = vadd.f32 %v229_v38, %v2348_v9  ;;  %1157 = vmatpush1.bf16.msra.mxu0 %v2032_v28  ;;  %1367 = vmatpush1.bf16.msra.mxu1 %v2035_v29  ;;  %v414_v52 = vmax.f32 %v226_v34, 0.0  ;;  %v339_v20 = vadd.f32 %v338_v15, %v2365_v30  ;;  %v340_v21 = vpop.f32.mrb[6].mxu1  ;;  %v2048_v38 = vld [vmem:[%s2818_s3 + $0x1e0] ss:$12 sps:$4 sm:$0xff]   ;;  %v2056_v15 = vld [vmem:[%s2818_s3 + $0x210] ss:$12 sps:$4 sm:$0xff]  }
  0xea   :  { %v417_v47 = vmax.f32 %v228_v37, 0.0  ;;  %1158 = vmatprep.subr.bf16.mxu0 %v2038_v33  ;;  %1368 = vmatprep.subr.bf16.mxu1 %v2068_v1  ;;  %v415_v26 = vmax.f32 %v337_v14, 0.0  ;;  %v341_v27 = vadd.f32 %v340_v21, %v2357_v25  ;;  %v342_v28 = vpop.f32.mrb[7].mxu1  ;;  %v2062_v21 = vld [vmem:[%s2818_s3 + $0x22c] ss:$12 sps:$4 sm:$0xff]  }
  0xeb   :  { %v418_v53 = vmax.f32 %v230_v41, 0.0  ;;  %v416_v32 = vmax.f32 %v339_v20, 0.0  ;;  %v343_v33 = vadd.f32 %v342_v28, %v2365_v30 }
  0xec   :  { %v473_v56 = vpack.c.bf16 %v417_v47, %v413_v46  ;;  %v419_v35 = vmax.f32 %v341_v27, 0.0 }
  0xed   :  { %v474_v58 = vpack.c.bf16 %v418_v53, %v414_v52  ;;  %v233_v59 = vpop.f32.mrb[8].mxu0  ;;  %1159 = vmatpush1.bf16.msra.mxu0 %v2036_v42  ;;  %1369 = vmatpush1.bf16.msra.mxu1 %v2039_v43  ;;  %v420_v40 = vmax.f32 %v343_v33, 0.0  ;;  %v2054_v43 = vld [vmem:[%s2818_s3 + $0x1fc] ss:$12 sps:$4 sm:$0xff]  }
  0xee   :  { %v234_v63 = vadd.f32 %v233_v59, %v2345_v8  ;;  %v235_v0 = vpop.f32.mrb[9].mxu0  ;;  %1160 = vmatprep.subr.bf16.mxu0 %v2042_v48  ;;  %1370 = vmatprep.subr.bf16.mxu1 %v2068_v1  ;;  %v2431_v44 = vpack.c.bf16 %v419_v35, %v415_v26  ;;  %v2063_v35 = vld [vmem:[%s2818_s3 + $0x230] ss:$12 sps:$4 sm:$0xff]  }
  0xef   :  { %v236_v4 = vadd.f32 %v235_v0, %v2348_v9  ;;  %v237_v6 = vpop.f32.mrb[10].mxu0  ;;  %1085 = vmatprep.mubr.bf16.mxu0 %v474_v58  ;;  %1309 = vmatprep.mubr.bf16.mxu1 %v474_v58  ;;  %v2434_v47 = vpack.c.bf16 %v420_v40, %v416_v32  ;;  %v346_v48 = vpop.f32.mrb[8].mxu1  ;;  %v2066_v40 = vld [vmem:[%s2818_s3 + $0x244] ss:$12 sps:$4 sm:$0xff]  }
  0xf0   :  { %v238_v12 = vadd.f32 %v237_v6, %v2345_v8  ;;  %v239_v13 = vpop.f32.mrb[11].mxu0  ;;  %1086 = vmatmul.mubr.bf16.gmra.mrb[36].mxu0 %v473_v56  ;;  %1310 = vmatmul.mubr.bf16.gmra.mrb[36].mxu1 %v473_v56  ;;  %v421_v22 = vmax.f32 %v234_v63, 0.0  ;;  %v347_v51 = vadd.f32 %v346_v48, %v2357_v25  ;;  %v348_v52 = vpop.f32.mrb[9].mxu1 }
  0xf1   :  { %v240_v16 = vadd.f32 %v239_v13, %v2348_v9  ;;  %1161 = vmatpush1.bf16.msra.mxu0 %v2040_v60  ;;  %1371 = vmatpush1.bf16.msra.mxu1 %v2043_v61  ;;  %v422_v29 = vmax.f32 %v236_v4, 0.0  ;;  %v349_v56 = vadd.f32 %v348_v52, %v2365_v30  ;;  %v350_v57 = vpop.f32.mrb[10].mxu1  ;;  %v2058_v60 = vld [vmem:[%s2818_s3 + $0x214] ss:$12 sps:$4 sm:$0xff]  }
  0xf2   :  { %v425_v23 = vmax.f32 %v238_v12, 0.0  ;;  %1162 = vmatprep.subr.bf16.mxu0 %v2046_v2  ;;  %1372 = vmatprep.subr.bf16.mxu1 %v2068_v1  ;;  %v423_v61 = vmax.f32 %v347_v51, 0.0  ;;  %v351_v62 = vadd.f32 %v350_v57, %v2357_v25  ;;  %v352_v63 = vpop.f32.mrb[11].mxu1 }
  0xf3   :  { %v426_v31 = vmax.f32 %v240_v16, 0.0  ;;  %v424_v4 = vmax.f32 %v349_v56, 0.0  ;;  %v353_v6 = vadd.f32 %v352_v63, %v2365_v30  ;;  %v2059_v16 = vld [vmem:[%s2818_s3 + $0x218] ss:$12 sps:$4 sm:$0xff]  }
  0xf4   :  { %v477_v34 = vpack.c.bf16 %v425_v23, %v421_v22  ;;  %v427_v12 = vmax.f32 %v351_v62, 0.0 }
  0xf5   :  { %v478_v36 = vpack.c.bf16 %v426_v31, %v422_v29  ;;  %v243_v37 = vpop.f32.mrb[12].mxu0  ;;  %1163 = vmatpush1.bf16.msra.mxu0 %v2044_v18  ;;  %1373 = vmatpush1.bf16.msra.mxu1 %v2047_v19  ;;  %v428_v18 = vmax.f32 %v353_v6, 0.0 }
  0xf6   :  { %v244_v41 = vadd.f32 %v243_v37, %v2345_v8  ;;  %v245_v42 = vpop.f32.mrb[13].mxu0  ;;  %1164 = vmatprep.subr.bf16.mxu0 %v2050_v24  ;;  %1374 = vmatprep.subr.bf16.mxu1 %v2068_v1  ;;  %v2463_v22 = vpack.c.bf16 %v427_v12, %v423_v61 }
  0xf7   :  { %v246_v45 = vadd.f32 %v245_v42, %v2348_v9  ;;  %v247_v46 = vpop.f32.mrb[14].mxu0  ;;  %1095 = vmatprep.mubr.bf16.mxu0 %v478_v36  ;;  %1317 = vmatprep.mubr.bf16.mxu1 %v478_v36  ;;  %v2466_v26 = vpack.c.bf16 %v428_v18, %v424_v4  ;;  %v356_v27 = vpop.f32.mrb[12].mxu1 }
  0xf8   :  { %v248_v49 = vadd.f32 %v247_v46, %v2345_v8  ;;  %v249_v50 = vpop.f32.mrb[15].mxu0  ;;  %1096 = vmatmul.mubr.bf16.gmra.mrb[40].mxu0 %v477_v34  ;;  %1318 = vmatmul.mubr.bf16.gmra.mrb[40].mxu1 %v477_v34  ;;  %v429_v58 = vmax.f32 %v244_v41, 0.0  ;;  %v357_v31 = vadd.f32 %v356_v27, %v2357_v25  ;;  %v358_v32 = vpop.f32.mrb[13].mxu1  ;;  %v2060_v34 = vld [vmem:[%s2818_s3 + $0x228] ss:$12 sps:$4 sm:$0xff]  }
  0xf9   :  { %v250_v53 = vadd.f32 %v249_v50, %v2348_v9  ;;  %1165 = vmatpush1.bf16.msra.mxu0 %v2048_v38  ;;  %1375 = vmatpush1.bf16.msra.mxu1 %v2051_v39  ;;  %v430_v0 = vmax.f32 %v246_v45, 0.0  ;;  %v359_v36 = vadd.f32 %v358_v32, %v2365_v30  ;;  %v360_v37 = vpop.f32.mrb[14].mxu1 }
  0xfa   :  { %v433_v59 = vmax.f32 %v248_v49, 0.0  ;;  %1166 = vmatprep.subr.bf16.mxu0 %v2054_v43  ;;  %1376 = vmatprep.subr.bf16.mxu1 %v2068_v1  ;;  %v431_v41 = vmax.f32 %v357_v31, 0.0  ;;  %v361_v42 = vadd.f32 %v360_v37, %v2357_v25  ;;  %v362_v43 = vpop.f32.mrb[15].mxu1 }
  0xfb   :  { %v434_v2 = vmax.f32 %v250_v53, 0.0  ;;  %v432_v48 = vmax.f32 %v359_v36, 0.0  ;;  %v363_v49 = vadd.f32 %v362_v43, %v2365_v30 }
  0xfc   :  { %v481_v11 = vpack.c.bf16 %v433_v59, %v429_v58  ;;  %v435_v51 = vmax.f32 %v361_v42, 0.0 }
  0xfd   :  { %v482_v13 = vpack.c.bf16 %v434_v2, %v430_v0  ;;  %v253_v14 = vpop.f32.mrb[16].mxu0  ;;  %1167 = vmatpush1.bf16.msra.mxu0 %v2052_v54  ;;  %1377 = vmatpush1.bf16.msra.mxu1 %v2055_v55  ;;  %v2064_v54 = vld [vmem:[%s2818_s3 + $0x240] ss:$12 sps:$4 sm:$0xff]   ;;  %v2067_v55 = vld [vmem:[%s2818_s3 + $0x248] ss:$12 sps:$4 sm:$0xff]   ;;  %v436_v56 = vmax.f32 %v363_v49, 0.0 }
  0xfe   :  { %v254_v19 = vadd.f32 %v253_v14, %v2345_v8  ;;  %v255_v20 = vpop.f32.mrb[17].mxu0  ;;  %1168 = vmatprep.subr.bf16.mxu0 %v2058_v60  ;;  %1378 = vmatprep.subr.bf16.mxu1 %v2068_v1  ;;  %v2492_v59 = vpack.c.bf16 %v435_v51, %v431_v41 }
  0xff   :  { %v256_v23 = vadd.f32 %v255_v20, %v2348_v9  ;;  %v257_v24 = vpop.f32.mrb[18].mxu0  ;;  %1105 = vmatprep.mubr.bf16.mxu0 %v482_v13  ;;  %1325 = vmatprep.mubr.bf16.mxu1 %v482_v13  ;;  %v2495_v62 = vpack.c.bf16 %v436_v56, %v432_v48  ;;  %v366_v63 = vpop.f32.mrb[16].mxu1 }
 0x100   :  { %v258_v28 = vadd.f32 %v257_v24, %v2345_v8  ;;  %v259_v29 = vpop.f32.mrb[19].mxu0  ;;  %1106 = vmatmul.mubr.bf16.gmra.mrb[44].mxu0 %v481_v11  ;;  %1326 = vmatmul.mubr.bf16.gmra.mrb[44].mxu1 %v481_v11  ;;  %v437_v38 = vmax.f32 %v254_v19, 0.0  ;;  %v367_v4 = vadd.f32 %v366_v63, %v2357_v25  ;;  %v368_v6 = vpop.f32.mrb[17].mxu1 }
 0x101   :  { %v260_v33 = vadd.f32 %v259_v29, %v2348_v9  ;;  %1169 = vmatpush1.bf16.msra.mxu0 %v2056_v15  ;;  %1379 = vmatpush1.bf16.msra.mxu1 %v2059_v16  ;;  %v438_v45 = vmax.f32 %v256_v23, 0.0  ;;  %v369_v11 = vadd.f32 %v368_v6, %v2365_v30  ;;  %v370_v12 = vpop.f32.mrb[18].mxu1 }
 0x102   :  { %v441_v39 = vmax.f32 %v258_v28, 0.0  ;;  %1170 = vmatprep.subr.bf16.mxu0 %v2062_v21  ;;  %1380 = vmatprep.subr.bf16.mxu1 %v2068_v1  ;;  %v439_v15 = vmax.f32 %v367_v4, 0.0  ;;  %v371_v16 = vadd.f32 %v370_v12, %v2357_v25  ;;  %v372_v18 = vpop.f32.mrb[19].mxu1 }
 0x103   :  { %v442_v46 = vmax.f32 %v260_v33, 0.0  ;;  %v440_v21 = vmax.f32 %v369_v11, 0.0  ;;  %v373_v23 = vadd.f32 %v372_v18, %v2365_v30 }
 0x104   :  { %v485_v50 = vpack.c.bf16 %v441_v39, %v437_v38  ;;  %v443_v27 = vmax.f32 %v371_v16, 0.0 }
 0x105   :  { %v486_v52 = vpack.c.bf16 %v442_v46, %v438_v45  ;;  %v263_v53 = vpop.f32.mrb[20].mxu0  ;;  %1171 = vmatpush1.bf16.msra.mxu0 %v2060_v34  ;;  %1381 = vmatpush1.bf16.msra.mxu1 %v2063_v35  ;;  %v444_v31 = vmax.f32 %v373_v23, 0.0 }
 0x106   :  { %v264_v57 = vadd.f32 %v263_v53, %v2345_v8  ;;  %v265_v58 = vpop.f32.mrb[21].mxu0  ;;  %1172 = vmatprep.subr.bf16.mxu0 %v2066_v40  ;;  %1382 = vmatprep.subr.bf16.mxu1 %v2068_v1  ;;  %v2504_v34 = vpack.c.bf16 %v443_v27, %v439_v15 }
 0x107   :  { %v266_v60 = vadd.f32 %v265_v58, %v2348_v9  ;;  %v267_v61 = vpop.f32.mrb[22].mxu0  ;;  %1115 = vmatprep.mubr.bf16.mxu0 %v486_v52  ;;  %1333 = vmatprep.mubr.bf16.mxu1 %v486_v52  ;;  %v2507_v37 = vpack.c.bf16 %v444_v31, %v440_v21  ;;  %v376_v38 = vpop.f32.mrb[20].mxu1 }
 0x108   :  { %v268_v0 = vadd.f32 %v267_v61, %v2345_v8  ;;  %v269_v2 = vpop.f32.mrb[23].mxu0  ;;  %1116 = vmatmul.mubr.bf16.gmra.mrb[48].mxu0 %v485_v50  ;;  %1334 = vmatmul.mubr.bf16.gmra.mrb[48].mxu1 %v485_v50  ;;  %v445_v13 = vmax.f32 %v264_v57, 0.0  ;;  %v377_v41 = vadd.f32 %v376_v38, %v2357_v25  ;;  %v378_v42 = vpop.f32.mrb[21].mxu1 }
 0x109   :  { %v270_v1 = vadd.f32 %v269_v2, %v2348_v9  ;;  %1173 = vmatpush1.bf16.msra.mxu0 %v2064_v54  ;;  %1383 = vmatpush1.bf16.msra.mxu1 %v2067_v55  ;;  %v446_v19 = vmax.f32 %v266_v60, 0.0  ;;  %v379_v45 = vadd.f32 %v378_v42, %v2365_v30  ;;  %v380_v46 = vpop.f32.mrb[22].mxu1 }
 0x10a   :  { %v449_v14 = vmax.f32 %v268_v0, 0.0  ;;  %v447_v50 = vmax.f32 %v377_v41, 0.0  ;;  %v381_v51 = vadd.f32 %v380_v46, %v2357_v25  ;;  %v382_v52 = vpop.f32.mrb[23].mxu1 }
 0x10b   :  { %v450_v20 = vmax.f32 %v270_v1, 0.0  ;;  %v448_v55 = vmax.f32 %v379_v45, 0.0  ;;  %v383_v56 = vadd.f32 %v382_v52, %v2365_v30 }
 0x10c   :  { %v489_v24 = vpack.c.bf16 %v449_v14, %v445_v13  ;;  %v451_v58 = vmax.f32 %v381_v51, 0.0 }
 0x10d   :  { %v490_v28 = vpack.c.bf16 %v450_v20, %v446_v19  ;;  %v273_v29 = vpop.f32.mrb[24].mxu0  ;;  %v452_v63 = vmax.f32 %v383_v56, 0.0 }
 0x10e   :  { %v274_v32 = vadd.f32 %v273_v29, %v2345_v8  ;;  %v275_v33 = vpop.f32.mrb[25].mxu0  ;;  %v2516_v4 = vpack.c.bf16 %v451_v58, %v447_v50 }
 0x10f   :  { %v276_v35 = vadd.f32 %v275_v33, %v2348_v9  ;;  %v277_v36 = vpop.f32.mrb[26].mxu0  ;;  %1125 = vmatprep.mubr.bf16.mxu0 %v490_v28  ;;  %1341 = vmatprep.mubr.bf16.mxu1 %v490_v28  ;;  %v2519_v11 = vpack.c.bf16 %v452_v63, %v448_v55  ;;  %v386_v12 = vpop.f32.mrb[24].mxu1 }
 0x110   :  { %v278_v39 = vadd.f32 %v277_v36, %v2345_v8  ;;  %v279_v40 = vpop.f32.mrb[27].mxu0  ;;  %1126 = vmatmul.mubr.bf16.gmra.mrb[52].mxu0 %v489_v24  ;;  %1342 = vmatmul.mubr.bf16.gmra.mrb[52].mxu1 %v489_v24  ;;  %v453_v48 = vmax.f32 %v274_v32, 0.0  ;;  %v387_v15 = vadd.f32 %v386_v12, %v2357_v25  ;;  %v388_v16 = vpop.f32.mrb[25].mxu1 }
 0x111   :  { %v280_v43 = vadd.f32 %v279_v40, %v2348_v9  ;;  %v454_v53 = vmax.f32 %v276_v35, 0.0  ;;  %v389_v19 = vadd.f32 %v388_v16, %v2365_v30  ;;  %v390_v20 = vpop.f32.mrb[26].mxu1 }
 0x112   :  { %v457_v49 = vmax.f32 %v278_v39, 0.0  ;;  %v455_v24 = vmax.f32 %v387_v15, 0.0  ;;  %v391_v27 = vadd.f32 %v390_v20, %v2357_v25  ;;  %v392_v28 = vpop.f32.mrb[27].mxu1 }
 0x113   :  { %v458_v54 = vmax.f32 %v280_v43, 0.0  ;;  %v393_v32 = vadd.f32 %v392_v28, %v2365_v30 }
 0x114   :  { %v493_v57 = vpack.c.bf16 %v457_v49, %v453_v48  ;;  %v459_v35 = vmax.f32 %v391_v27, 0.0 }
 0x115   :  { %v494_v60 = vpack.c.bf16 %v458_v54, %v454_v53  ;;  %v283_v61 = vpop.f32.mrb[28].mxu0  ;;  %v460_v38 = vmax.f32 %v393_v32, 0.0 }
 0x116   :  { %v284_v0 = vadd.f32 %v283_v61, %v2345_v8  ;;  %v285_v2 = vpop.f32.mrb[29].mxu0 }
 0x117   :  { %v286_v6 = vadd.f32 %v285_v2, %v2348_v9  ;;  %v287_v1 = vpop.f32.mrb[30].mxu0  ;;  %1135 = vmatprep.mubr.bf16.mxu0 %v494_v60  ;;  %1349 = vmatprep.mubr.bf16.mxu1 %v494_v60  ;;  %v396_v40 = vpop.f32.mrb[28].mxu1 }
 0x118   :  { %v288_v13 = vadd.f32 %v287_v1, %v2345_v8  ;;  %v289_v14 = vpop.f32.mrb[31].mxu0  ;;  %1136 = vmatmul.mubr.bf16.gmra.mrb[56].mxu0 %v493_v57  ;;  %1350 = vmatmul.mubr.bf16.gmra.mrb[56].mxu1 %v493_v57  ;;  %v461_v21 = vmax.f32 %v284_v0, 0.0  ;;  %v456_v8 = vmax.f32 %v389_v19, 0.0  ;;  %v397_v41 = vadd.f32 %v396_v40, %v2357_v25  ;;  %v398_v42 = vpop.f32.mrb[29].mxu1 }
 0x119   :  { %v290_v18 = vadd.f32 %v289_v14, %v2348_v9  ;;  %v462_v29 = vmax.f32 %v286_v6, 0.0  ;;  %v495_v9 = vpack.c.bf16 %v459_v35, %v455_v24  ;;  %v399_v43 = vadd.f32 %v398_v42, %v2365_v30  ;;  %v400_v45 = vpop.f32.mrb[30].mxu1 }
 0x11a   :  { %v465_v23 = vmax.f32 %v288_v13, 0.0  ;;  %v496_v39 = vpack.c.bf16 %v460_v38, %v456_v8  ;;  %v463_v46 = vmax.f32 %v397_v41, 0.0  ;;  %v401_v48 = vadd.f32 %v400_v45, %v2357_v25  ;;  %v402_v49 = vpop.f32.mrb[31].mxu1  ;;  %v1511_v45 = vld [vmem:[%s2821_s5] sm:$0x7] }
 0x11b   :  { %v466_v31 = vmax.f32 %v290_v18, 0.0  ;;  %v464_v50 = vmax.f32 %v399_v43, 0.0  ;;  %v403_v51 = vadd.f32 %v402_v49, %v2365_v30 }
 0x11c   :  { %v497_v33 = vpack.c.bf16 %v465_v23, %v461_v21  ;;  %v467_v52 = vmax.f32 %v401_v48, 0.0 }
 0x11d   :  { %v498_v36 = vpack.c.bf16 %v466_v31, %v462_v29  ;;  %v468_v53 = vmax.f32 %v403_v51, 0.0 }
 0x11e   :  { %v499_v54 = vpack.c.bf16 %v467_v52, %v463_v46 }
 0x11f   :  { %1145 = vmatprep.mubr.bf16.mxu0 %v498_v36  ;;  %1357 = vmatprep.mubr.bf16.mxu1 %v498_v36  ;;  %v500_v55 = vpack.c.bf16 %v468_v53, %v464_v50  ;;  %v601_v36 = vld [vmem:[%s2820_s4] sm:$0x7]  ;;  %v2616_v50 = vrot.slane %v1511_v45, %v2337_v5 }
 0x120   :  { %1146 = vmatmul.mubr.bf16.gmra.mrb[60].mxu0 %v497_v33  ;;  %1358 = vmatmul.mubr.bf16.gmra.mrb[60].mxu1 %v497_v33  ;;  %v2601_v41 = vrot.slane %v601_v36, %v2353_v17  ;;  %v2606_v43 = vrot.slane %v601_v36, %v2337_v5  ;;  %v2612_v46 = vrot.slane %v601_v36, %v2342_v7 }
 0x121   :  { %1803 = vmatprep.mubr.msk.bf16.mxu0 %vm1018_vm1, %v2402_v10  ;;  %1811 = vmatprep.mubr.msk.bf16.mxu1 %vm1018_vm1, %v2402_v10 }
 0x128   :  { %1189 = vmatmul.mubr.bf16.vlgmr.msra.gmra.mrb[32].mxu0 %v2399_v3  ;;  %1399 = vmatmul.mubr.bf16.vlgmr.msra.gmra.mrb[64].mxu1 %v2399_v3 }
 0x129   :  { %1804 = vmatprep.mubr.msk.bf16.mxu0 %vm1018_vm1, %v2434_v47  ;;  %1812 = vmatprep.mubr.msk.bf16.mxu1 %vm1018_vm1, %v2434_v47 }
 0x130   :  { %1199 = vmatmul.mubr.bf16.gmra.mrb[36].mxu0 %v2431_v44  ;;  %1407 = vmatmul.mubr.bf16.gmra.mrb[68].mxu1 %v2431_v44 }
 0x131   :  { %1805 = vmatprep.mubr.msk.bf16.mxu0 %vm1018_vm1, %v2466_v26  ;;  %1813 = vmatprep.mubr.msk.bf16.mxu1 %vm1018_vm1, %v2466_v26 }
 0x138   :  { %1209 = vmatmul.mubr.bf16.gmra.mrb[40].mxu0 %v2463_v22  ;;  %1415 = vmatmul.mubr.bf16.gmra.mrb[72].mxu1 %v2463_v22 }
 0x139   :  { %1806 = vmatprep.mubr.msk.bf16.mxu0 %vm1018_vm1, %v2495_v62  ;;  %1814 = vmatprep.mubr.msk.bf16.mxu1 %vm1018_vm1, %v2495_v62 }
 0x140   :  { %1219 = vmatmul.mubr.bf16.gmra.mrb[44].mxu0 %v2492_v59  ;;  %1423 = vmatmul.mubr.bf16.gmra.mrb[76].mxu1 %v2492_v59 }
 0x141   :  { %1807 = vmatprep.mubr.msk.bf16.mxu0 %vm1018_vm1, %v2507_v37  ;;  %1815 = vmatprep.mubr.msk.bf16.mxu1 %vm1018_vm1, %v2507_v37 }
 0x148   :  { %1229 = vmatmul.mubr.bf16.gmra.mrb[48].mxu0 %v2504_v34  ;;  %1431 = vmatmul.mubr.bf16.gmra.mrb[80].mxu1 %v2504_v34 }
 0x149   :  { %1808 = vmatprep.mubr.msk.bf16.mxu0 %vm1018_vm1, %v2519_v11  ;;  %1816 = vmatprep.mubr.msk.bf16.mxu1 %vm1018_vm1, %v2519_v11 }
 0x150   :  { %1239 = vmatmul.mubr.bf16.gmra.mrb[52].mxu0 %v2516_v4  ;;  %1439 = vmatmul.mubr.bf16.gmra.mrb[84].mxu1 %v2516_v4 }
 0x151   :  { %1809 = vmatprep.mubr.msk.bf16.mxu0 %vm1018_vm1, %v496_v39  ;;  %1817 = vmatprep.mubr.msk.bf16.mxu1 %vm1018_vm1, %v496_v39 }
 0x158   :  { %1249 = vmatmul.mubr.bf16.gmra.mrb[56].mxu0 %v495_v9  ;;  %1447 = vmatmul.mubr.bf16.gmra.mrb[88].mxu1 %v495_v9 }
 0x159   :  { %1810 = vmatprep.mubr.msk.bf16.mxu0 %vm1018_vm1, %v500_v55  ;;  %1818 = vmatprep.mubr.msk.bf16.mxu1 %vm1018_vm1, %v500_v55 }
 0x160   :  { %1259 = vmatmul.mubr.bf16.gmra.mrb[60].mxu0 %v499_v54  ;;  %1455 = vmatmul.mubr.bf16.gmra.mrb[92].mxu1 %v499_v54 }
 0x1bb   :  { %v1835_v25 = vpop.f32.mrb[32].mxu1 }
 0x1bc   :  { %v1836_v30 = vpop.f32.mrb[33].mxu1 }
 0x1bd   :  { %v1837_v3 = vadd.f32 %v1836_v30, %v1835_v25  ;;  %v1838_v10 = vpop.f32.mrb[34].mxu1  ;;  %v2621_v30 = vrot.slane %v1511_v45, %v2353_v17 }
 0x1be   :  { %v1839_v44 = vpop.f32.mrb[35].mxu1 }
 0x1bf   :  { %v1840_v47 = vadd.f32 %v1839_v44, %v1838_v10  ;;  %v1304_v48 = vadd.f32 %v1837_v3, %v2601_v41  ;;  %v2625_v44 = vrot.slane %v1511_v45, %v2342_v7 }
 0x1c1   :  { %v1307_v25 = vadd.f32 %v1840_v47, %v2601_v41 }
 0x1c3   :  { %v1841_v22 = vpop.f32.mrb[36].mxu1 }
 0x1c4   :  { %v1842_v26 = vpop.f32.mrb[37].mxu1 }
 0x1c5   :  { %v2571_v59 = vadd.f32 %v1842_v26, %v1841_v22  ;;  %v1844_v62 = vpop.f32.mrb[38].mxu1 }
 0x1c6   :  { %v1845_v34 = vpop.f32.mrb[39].mxu1 }
 0x1c7   :  { %v2573_v37 = vadd.f32 %v1845_v34, %v1844_v62 }
 0x1cb   :  { %v1847_v56 = vpop.f32.mrb[40].mxu1 }
 0x1cc   :  { %v1848_v57 = vpop.f32.mrb[41].mxu1 }
 0x1cd   :  { %v2575_v58 = vadd.f32 %v1848_v57, %v1847_v56  ;;  %v1850_v60 = vpop.f32.mrb[42].mxu1 }
 0x1ce   :  { %v1851_v61 = vpop.f32.mrb[43].mxu1 }
 0x1cf   :  { %v2577_v63 = vadd.f32 %v1851_v61, %v1850_v60 }
 0x1d3   :  { %v1853_v0 = vpop.f32.mrb[44].mxu1 }
 0x1d4   :  { %v1854_v2 = vpop.f32.mrb[45].mxu1 }
 0x1d5   :  { %v2579_v4 = vadd.f32 %v1854_v2, %v1853_v0  ;;  %v1856_v6 = vpop.f32.mrb[46].mxu1 }
 0x1d6   :  { %v1857_v1 = vpop.f32.mrb[47].mxu1 }
 0x1d7   :  { %v2581_v11 = vadd.f32 %v1857_v1, %v1856_v6 }
 0x1db   :  { %v1859_v12 = vpop.f32.mrb[48].mxu1 }
 0x1dc   :  { %v1860_v13 = vpop.f32.mrb[49].mxu1 }
 0x1dd   :  { %v2583_v14 = vadd.f32 %v1860_v13, %v1859_v12  ;;  %v1862_v15 = vpop.f32.mrb[50].mxu1  ;;  %v1312_v13 = vadd.f32 %v2571_v59, %v2601_v41 }
 0x1de   :  { %v1863_v16 = vpop.f32.mrb[51].mxu1 }
 0x1df   :  { %v2585_v18 = vadd.f32 %v1863_v16, %v1862_v15 }
 0x1e3   :  { %v1865_v19 = vpop.f32.mrb[52].mxu1 }
 0x1e4   :  { %v1866_v20 = vpop.f32.mrb[53].mxu1 }
 0x1e5   :  { %v2587_v21 = vadd.f32 %v1866_v20, %v1865_v19  ;;  %v1868_v23 = vpop.f32.mrb[54].mxu1 }
 0x1e6   :  { %v1869_v24 = vpop.f32.mrb[55].mxu1 }
 0x1e7   :  { %v2589_v27 = vadd.f32 %v1869_v24, %v1868_v23 }
 0x1eb   :  { %v1871_v28 = vpop.f32.mrb[56].mxu1 }
 0x1ec   :  { %v1872_v29 = vpop.f32.mrb[57].mxu1 }
 0x1ed   :  { %v2591_v31 = vadd.f32 %v1872_v29, %v1871_v28  ;;  %v1874_v8 = vpop.f32.mrb[58].mxu1 }
 0x1ee   :  { %v1875_v32 = vpop.f32.mrb[59].mxu1 }
 0x1ef   :  { %v2593_v33 = vadd.f32 %v1875_v32, %v1874_v8  ;;  %v1315_v8 = vadd.f32 %v2573_v37, %v2601_v41 }
 0x1f3   :  { %v1877_v35 = vpop.f32.mrb[60].mxu1 }
 0x1f4   :  { %v1878_v38 = vpop.f32.mrb[61].mxu1 }
 0x1f5   :  { %v2598_v9 = vadd.f32 %v1878_v38, %v1877_v35  ;;  %v1880_v39 = vpop.f32.mrb[62].mxu1 }
 0x1f6   :  { %v1881_v40 = vpop.f32.mrb[63].mxu1 }
 0x1f7   :  { %v2603_v42 = vadd.f32 %v1881_v40, %v1880_v39 }
 0x1fb   :  { %v1190_v49 = vpop.f32.mrb[32].mxu0  ;;  %v1400_v51 = vpop.f32.mrb[64].mxu1 }
 0x1fc   :  { %v1883_v52 = vadd.f32 %v1190_v49, %v2606_v43  ;;  %v1401_v53 = vadd.f32 %v1400_v51, %v1304_v48  ;;  %v1192_v54 = vpop.f32.mrb[33].mxu0  ;;  %v1402_v55 = vpop.f32.mrb[65].mxu1 }
 0x1fd   :  { %v1884_v10 = vadd.f32 %v1192_v54, %v2612_v46  ;;  %v1194_v3 = vpop.f32.mrb[34].mxu0  ;;  %v1403_v22 = vpop.f32.mrb[66].mxu1 }
 0x1fe   :  { %v1463_v5 = vmax.f32 %v1883_v52, 0.0  ;;  %v1465_v26 = vmax.f32 %v1401_v53, 0.0  ;;  %v1885_v62 = vadd.f32 %v1194_v3, %v2606_v43  ;;  %v1404_v34 = vadd.f32 %v1403_v22, %v1307_v25  ;;  %v1196_v56 = vpop.f32.mrb[35].mxu0  ;;  %v1405_v57 = vpop.f32.mrb[67].mxu1 }
 0x1ff   :  { %v1464_v60 = vmax.f32 %v1884_v10, 0.0  ;;  %v1886_v47 = vadd.f32 %v1196_v56, %v2612_v46  ;;  %v1320_v56 = vadd.f32 %v2575_v58, %v2601_v41 }
 0x200   :  { %v1528_v17 = vmul.f32 %v2616_v50, %v1463_v5  ;;  %v1466_v61 = vmax.f32 %v1885_v62, 0.0  ;;  %v1468_v0 = vmax.f32 %v1404_v34, 0.0  ;;  %v1530_v2 = vmul.f32 %v2621_v30, %v1465_v26 }
 0x201   :  { %v1529_v7 = vmul.f32 %v2625_v44, %v1464_v60  ;;  %v1467_v6 = vmax.f32 %v1886_v47, 0.0 }
 0x202   :  { %v1531_v1 = vmul.f32 %v2616_v50, %v1466_v61  ;;  %v1533_v12 = vmul.f32 %v2621_v30, %v1468_v0  ;;  %v1578_v32 = vsel %vm1577_vm2, %v1530_v2, 0.0 }
 0x203   :  { %v1532_v15 = vmul.f32 %v2625_v44, %v1467_v6  ;;  %v1200_v16 = vpop.f32.mrb[36].mxu0  ;;  %v1408_v19 = vpop.f32.mrb[68].mxu1  ;;  %v1576_v20 = vadd.f32 %v1529_v7, %v1528_v17  ;;  %v1323_v6 = vadd.f32 %v2577_v63, %v2601_v41 }
 0x204   :  { %v1887_v23 = vadd.f32 %v1200_v16, %v2606_v43  ;;  %v1409_v24 = vadd.f32 %v1408_v19, %v1312_v13  ;;  %v1202_v28 = vpop.f32.mrb[37].mxu0  ;;  %v1410_v29 = vpop.f32.mrb[69].mxu1  ;;  %v1583_v40 = vsel %vm1577_vm2, %v1533_v12, 0.0 }
 0x205   :  { %v1888_v35 = vadd.f32 %v1202_v28, %v2612_v46  ;;  %v1204_v36 = vpop.f32.mrb[38].mxu0  ;;  %v1411_v38 = vpop.f32.mrb[70].mxu1  ;;  %v1579_v59 = vadd.f32 %v1578_v32, %v1576_v20  ;;  %v1582_v39 = vadd.f32 %v1532_v15, %v1531_v1 }
 0x206   :  { %v1469_v45 = vmax.f32 %v1887_v23, 0.0  ;;  %v1471_v48 = vmax.f32 %v1409_v24, 0.0  ;;  %v1889_v49 = vadd.f32 %v1204_v36, %v2606_v43  ;;  %v1412_v51 = vadd.f32 %v1411_v38, %v1315_v8  ;;  %v1206_v52 = vpop.f32.mrb[39].mxu0  ;;  %v1413_v53 = vpop.f32.mrb[71].mxu1 }
 0x207   :  { %v1470_v54 = vmax.f32 %v1888_v35, 0.0  ;;  %v1890_v37 = vadd.f32 %v1206_v52, %v2612_v46  ;;  %1580 = vadd.xlane.f32.xlu0 %v1579_v59  ;;  %v1584_v55 = vadd.f32 %v1583_v40, %v1582_v39 }
 0x208   :  { %v1534_v25 = vmul.f32 %v2616_v50, %v1469_v45  ;;  %v1472_v10 = vmax.f32 %v1889_v49, 0.0  ;;  %v1474_v3 = vmax.f32 %v1412_v51, 0.0  ;;  %v1536_v22 = vmul.f32 %v2621_v30, %v1471_v48 }
 0x209   :  { %v1535_v5 = vmul.f32 %v2625_v44, %v1470_v54  ;;  %v1473_v26 = vmax.f32 %v1890_v37, 0.0  ;;  %v1328_v51 = vadd.f32 %v2579_v4, %v2601_v41 }
 0x20a   :  { %v1537_v62 = vmul.f32 %v2616_v50, %v1472_v10  ;;  %v1539_v34 = vmul.f32 %v2621_v30, %v1474_v3  ;;  %v1588_v1 = vsel %vm1577_vm2, %v1536_v22, 0.0  ;;  %v1331_v22 = vadd.f32 %v2581_v11, %v2601_v41 }
 0x20b   :  { %v1538_v57 = vmul.f32 %v2625_v44, %v1473_v26  ;;  %v1210_v60 = vpop.f32.mrb[40].mxu0  ;;  %v1416_v47 = vpop.f32.mrb[72].mxu1  ;;  %1585 = vadd.xlane.f32.xlu0 %v1584_v55  ;;  %v1587_v17 = vadd.f32 %v1535_v5, %v1534_v25 }
 0x20c   :  { %v1891_v61 = vadd.f32 %v1210_v60, %v2606_v43  ;;  %v1417_v0 = vadd.f32 %v1416_v47, %v1320_v56  ;;  %v1212_v2 = vpop.f32.mrb[41].mxu0  ;;  %v1418_v7 = vpop.f32.mrb[73].mxu1  ;;  %v1593_v19 = vsel %vm1577_vm2, %v1539_v34, 0.0 }
 0x20d   :  { %v1892_v12 = vadd.f32 %v1212_v2, %v2612_v46  ;;  %v1214_v13 = vpop.f32.mrb[42].mxu0  ;;  %v1419_v58 = vpop.f32.mrb[74].mxu1  ;;  %v1589_v15 = vadd.f32 %v1588_v1, %v1587_v17  ;;  %v1592_v16 = vadd.f32 %v1538_v57, %v1537_v62 }
 0x20e   :  { %v1475_v20 = vmax.f32 %v1891_v61, 0.0  ;;  %v1477_v23 = vmax.f32 %v1417_v0, 0.0  ;;  %v1893_v24 = vadd.f32 %v1214_v13, %v2606_v43  ;;  %v1420_v28 = vadd.f32 %v1419_v58, %v1323_v6  ;;  %v1216_v29 = vpop.f32.mrb[43].mxu0  ;;  %v1421_v8 = vpop.f32.mrb[75].mxu1 }
 0x20f   :  { %v1476_v32 = vmax.f32 %v1892_v12, 0.0  ;;  %v1894_v63 = vadd.f32 %v1216_v29, %v2612_v46  ;;  %1590 = vadd.xlane.f32.xlu1 %v1589_v15  ;;  %v1594_v35 = vadd.f32 %v1593_v19, %v1592_v16 }
 0x210   :  { %v1540_v36 = vmul.f32 %v2616_v50, %v1475_v20  ;;  %v1542_v38 = vmul.f32 %v2621_v30, %v1477_v23  ;;  %v1478_v59 = vmax.f32 %v1893_v24, 0.0  ;;  %v1480_v39 = vmax.f32 %v1420_v28, 0.0 }
 0x211   :  { %v1541_v40 = vmul.f32 %v2625_v44, %v1476_v32  ;;  %v1479_v45 = vmax.f32 %v1894_v63, 0.0  ;;  %v1336_v23 = vadd.f32 %v2583_v14, %v2601_v41 }
 0x212   :  { %v1543_v48 = vmul.f32 %v2616_v50, %v1478_v59  ;;  %v1545_v49 = vmul.f32 %v2621_v30, %v1480_v39  ;;  %v1598_v5 = vsel %vm1577_vm2, %v1542_v38, 0.0  ;;  %v1339_v38 = vadd.f32 %v2585_v18, %v2601_v41 }
 0x213   :  { %v1544_v52 = vmul.f32 %v2625_v44, %v1479_v45  ;;  %v1220_v53 = vpop.f32.mrb[44].mxu0  ;;  %v1424_v54 = vpop.f32.mrb[76].mxu1  ;;  %1595 = vadd.xlane.f32.xlu1 %v1594_v35  ;;  %v1597_v37 = vadd.f32 %v1541_v40, %v1540_v36 }
 0x214   :  { %v1895_v55 = vadd.f32 %v1220_v53, %v2606_v43  ;;  %v1425_v25 = vadd.f32 %v1424_v54, %v1328_v51  ;;  %v1222_v10 = vpop.f32.mrb[45].mxu0  ;;  %v1426_v3 = vpop.f32.mrb[77].mxu1  ;;  %v1603_v57 = vsel %vm1577_vm2, %v1545_v49, 0.0 }
 0x215   :  { %v1896_v26 = vadd.f32 %v1222_v10, %v2612_v46  ;;  %v1224_v62 = vpop.f32.mrb[46].mxu0  ;;  %v1427_v4 = vpop.f32.mrb[78].mxu1  ;;  %v1599_v34 = vadd.f32 %v1598_v5, %v1597_v37  ;;  %v1602_v56 = vadd.f32 %v1544_v52, %v1543_v48 }
 0x216   :  { %v1481_v60 = vmax.f32 %v1895_v55, 0.0  ;;  %v1483_v47 = vmax.f32 %v1425_v25, 0.0  ;;  %v1897_v17 = vadd.f32 %v1224_v62, %v2606_v43  ;;  %v1428_v61 = vadd.f32 %v1427_v4, %v1331_v22  ;;  %v1226_v0 = vpop.f32.mrb[47].mxu0  ;;  %v1429_v2 = vpop.f32.mrb[79].mxu1 }
 0x217   :  { %v1482_v7 = vmax.f32 %v1896_v26, 0.0  ;;  %v1898_v11 = vadd.f32 %v1226_v0, %v2612_v46  ;;  %1600 = vadd.xlane.f32.xlu0 %v1599_v34  ;;  %v1604_v6 = vadd.f32 %v1603_v57, %v1602_v56  ;;  %v1344_v57 = vadd.f32 %v2587_v21, %v2601_v41 }
 0x218   :  { %v1546_v1 = vmul.f32 %v2616_v50, %v1481_v60  ;;  %v1548_v12 = vmul.f32 %v2621_v30, %v1483_v47  ;;  %v1484_v13 = vmax.f32 %v1897_v17, 0.0  ;;  %v1486_v58 = vmax.f32 %v1428_v61, 0.0 }
 0x219   :  { %v1547_v15 = vmul.f32 %v2625_v44, %v1482_v7  ;;  %v1485_v16 = vmax.f32 %v1898_v11, 0.0  ;;  %1605 = vadd.xlane.f32.xlu1 %v1604_v6  ;;  %v1347_v6 = vadd.f32 %v2589_v27, %v2601_v41 }
 0x21a   :  { %v1549_v19 = vmul.f32 %v2616_v50, %v1484_v13  ;;  %v1551_v20 = vmul.f32 %v2621_v30, %v1486_v58  ;;  %v1608_v59 = vsel %vm1577_vm2, %v1548_v12, 0.0 }
 0x21b   :  { %v1550_v24 = vmul.f32 %v2625_v44, %v1485_v16  ;;  %v1230_v28 = vpop.f32.mrb[48].mxu0  ;;  %v1432_v29 = vpop.f32.mrb[80].mxu1  ;;  %v1607_v8 = vadd.f32 %v1547_v15, %v1546_v1 }
 0x21c   :  { %v1899_v32 = vadd.f32 %v1230_v28, %v2606_v43  ;;  %v1433_v63 = vadd.f32 %v1432_v29, %v1336_v23  ;;  %v1232_v35 = vpop.f32.mrb[49].mxu0  ;;  %v1434_v36 = vpop.f32.mrb[81].mxu1  ;;  %v1613_v49 = vsel %vm1577_vm2, %v1551_v20, 0.0 }
 0x21d   :  { %v1900_v39 = vadd.f32 %v1232_v35, %v2612_v46  ;;  %v1234_v40 = vpop.f32.mrb[50].mxu0  ;;  %v1435_v45 = vpop.f32.mrb[82].mxu1  ;;  %v1609_v14 = vadd.f32 %v1608_v59, %v1607_v8  ;;  %v1612_v48 = vadd.f32 %v1550_v24, %v1549_v19 }
 0x21e   :  { %v1487_v51 = vmax.f32 %v1899_v32, 0.0  ;;  %v1489_v52 = vmax.f32 %v1433_v63, 0.0  ;;  %v1901_v53 = vadd.f32 %v1234_v40, %v2606_v43  ;;  %v1436_v54 = vadd.f32 %v1435_v45, %v1339_v38  ;;  %v1236_v37 = vpop.f32.mrb[51].mxu0  ;;  %v1437_v55 = vpop.f32.mrb[83].mxu1 }
 0x21f   :  { %v1488_v25 = vmax.f32 %v1900_v39, 0.0  ;;  %v1902_v18 = vadd.f32 %v1236_v37, %v2612_v46  ;;  %1610 = vadd.xlane.f32.xlu0 %v1609_v14  ;;  %v1614_v10 = vadd.f32 %v1613_v49, %v1612_v48  ;;  %v1352_v14 = vadd.f32 %v2591_v31, %v2601_v41 }
 0x220   :  { %v1552_v3 = vmul.f32 %v2616_v50, %v1487_v51  ;;  %v1554_v22 = vmul.f32 %v2621_v30, %v1489_v52  ;;  %v1490_v5 = vmax.f32 %v1901_v53, 0.0  ;;  %v1492_v26 = vmax.f32 %v1436_v54, 0.0 }
 0x221   :  { %v1553_v62 = vmul.f32 %v2625_v44, %v1488_v25  ;;  %v1491_v4 = vmax.f32 %v1902_v18, 0.0  ;;  %1615 = vadd.xlane.f32.xlu1 %v1614_v10  ;;  %v1355_v25 = vadd.f32 %v2593_v33, %v2601_v41 }
 0x222   :  { %v1555_v34 = vmul.f32 %v2616_v50, %v1490_v5  ;;  %v1557_v56 = vmul.f32 %v2621_v30, %v1492_v26  ;;  %v1618_v1 = vsel %vm1577_vm2, %v1554_v22, 0.0 }
 0x223   :  { %v1556_v60 = vmul.f32 %v2625_v44, %v1491_v4  ;;  %v1240_v47 = vpop.f32.mrb[52].mxu0  ;;  %v1440_v17 = vpop.f32.mrb[84].mxu1  ;;  %v1617_v61 = vadd.f32 %v1553_v62, %v1552_v3 }
 0x224   :  { %v1903_v0 = vadd.f32 %v1240_v47, %v2606_v43  ;;  %v1441_v2 = vadd.f32 %v1440_v17, %v1344_v57  ;;  %v1242_v7 = vpop.f32.mrb[53].mxu0  ;;  %v1442_v11 = vpop.f32.mrb[85].mxu1  ;;  %v1623_v16 = vsel %vm1577_vm2, %v1557_v56, 0.0 }
 0x225   :  { %v1904_v12 = vadd.f32 %v1242_v7, %v2612_v46  ;;  %v1244_v13 = vpop.f32.mrb[54].mxu0  ;;  %v1443_v58 = vpop.f32.mrb[86].mxu1  ;;  %v1619_v21 = vadd.f32 %v1618_v1, %v1617_v61  ;;  %v1622_v15 = vadd.f32 %v1556_v60, %v1555_v34 }
 0x226   :  { %v1493_v19 = vmax.f32 %v1903_v0, 0.0  ;;  %v1495_v20 = vmax.f32 %v1441_v2, 0.0  ;;  %v1905_v23 = vadd.f32 %v1244_v13, %v2606_v43  ;;  %v1444_v24 = vadd.f32 %v1443_v58, %v1347_v6  ;;  %v1246_v28 = vpop.f32.mrb[55].mxu0  ;;  %v1445_v29 = vpop.f32.mrb[87].mxu1 }
 0x227   :  { %v1494_v8 = vmax.f32 %v1904_v12, 0.0  ;;  %v1906_v27 = vadd.f32 %v1246_v28, %v2612_v46  ;;  %1620 = vadd.xlane.f32.xlu0 %v1619_v21  ;;  %v1624_v32 = vadd.f32 %v1623_v16, %v1622_v15  ;;  %v1360_v13 = vadd.f32 %v2598_v9, %v2601_v41 }
 0x228   :  { %v1558_v63 = vmul.f32 %v2616_v50, %v1493_v19  ;;  %v1560_v35 = vmul.f32 %v2621_v30, %v1495_v20  ;;  %v1496_v36 = vmax.f32 %v1905_v23, 0.0  ;;  %v1498_v38 = vmax.f32 %v1444_v24, 0.0 }
 0x229   :  { %v1559_v59 = vmul.f32 %v2625_v44, %v1494_v8  ;;  %v1497_v39 = vmax.f32 %v1906_v27, 0.0  ;;  %1625 = vadd.xlane.f32.xlu1 %v1624_v32  ;;  %v1363_v28 = vadd.f32 %v2603_v42, %v2601_v41 }
 0x22a   :  { %v1561_v40 = vmul.f32 %v2616_v50, %v1496_v36  ;;  %v1563_v45 = vmul.f32 %v2621_v30, %v1498_v38  ;;  %v1628_v18 = vsel %vm1577_vm2, %v1560_v35, 0.0 }
 0x22b   :  { %v1562_v48 = vmul.f32 %v2625_v44, %v1497_v39  ;;  %v1250_v49 = vpop.f32.mrb[56].mxu0  ;;  %v1448_v51 = vpop.f32.mrb[88].mxu1  ;;  %v1627_v52 = vadd.f32 %v1559_v59, %v1558_v63 }
 0x22c   :  { %v1907_v53 = vadd.f32 %v1250_v49, %v2606_v43  ;;  %v1449_v54 = vadd.f32 %v1448_v51, %v1352_v14  ;;  %v1252_v37 = vpop.f32.mrb[57].mxu0  ;;  %v1450_v55 = vpop.f32.mrb[89].mxu1  ;;  %v1633_v26 = vsel %vm1577_vm2, %v1563_v45, 0.0 }
 0x22d   :  { %v1908_v10 = vadd.f32 %v1252_v37, %v2612_v46  ;;  %v1254_v3 = vpop.f32.mrb[58].mxu0  ;;  %v1451_v22 = vpop.f32.mrb[90].mxu1  ;;  %v1629_v31 = vadd.f32 %v1628_v18, %v1627_v52  ;;  %v1632_v5 = vadd.f32 %v1562_v48, %v1561_v40 }
 0x22e   :  { %v1499_v62 = vmax.f32 %v1907_v53, 0.0  ;;  %v1501_v4 = vmax.f32 %v1449_v54, 0.0  ;;  %v1909_v34 = vadd.f32 %v1254_v3, %v2606_v43  ;;  %v1452_v56 = vadd.f32 %v1451_v22, %v1355_v25  ;;  %v1256_v57 = vpop.f32.mrb[59].mxu0  ;;  %v1453_v60 = vpop.f32.mrb[91].mxu1 }
 0x22f   :  { %v1500_v47 = vmax.f32 %v1908_v10, 0.0  ;;  %v1910_v33 = vadd.f32 %v1256_v57, %v2612_v46  ;;  %1630 = vadd.xlane.f32.xlu0 %v1629_v31  ;;  %v1634_v17 = vadd.f32 %v1633_v26, %v1632_v5  ;;  %v1658_v31 = vstv %s2822_s6 }
 0x230   :  { %v1564_v61 = vmul.f32 %v2616_v50, %v1499_v62  ;;  %v1566_v0 = vmul.f32 %v2621_v30, %v1501_v4  ;;  %v1502_v2 = vmax.f32 %v1909_v34, 0.0  ;;  %v1504_v7 = vmax.f32 %v1452_v56, 0.0 }
 0x231   :  { %v1565_v11 = vmul.f32 %v2625_v44, %v1500_v47  ;;  %v1503_v6 = vmax.f32 %v1910_v33, 0.0  ;;  %1635 = vadd.xlane.f32.xlu1 %v1634_v17 }
 0x232   :  { %v1567_v1 = vmul.f32 %v2616_v50, %v1502_v2  ;;  %v1569_v12 = vmul.f32 %v2621_v30, %v1504_v7  ;;  %v1638_v29 = vsel %vm1577_vm2, %v1566_v0, 0.0 }
 0x233   :  { %v1568_v58 = vmul.f32 %v2625_v44, %v1503_v6  ;;  %v1260_v21 = vpop.f32.mrb[60].mxu0  ;;  %v1456_v15 = vpop.f32.mrb[92].mxu1  ;;  %v1637_v16 = vadd.f32 %v1565_v11, %v1564_v61 }
 0x234   :  { %v1911_v19 = vadd.f32 %v1260_v21, %v2606_v43  ;;  %v1457_v20 = vadd.f32 %v1456_v15, %v1360_v13  ;;  %v1262_v23 = vpop.f32.mrb[61].mxu0  ;;  %v1458_v24 = vpop.f32.mrb[93].mxu1  ;;  %v1643_v35 = vsel %vm1577_vm2, %v1569_v12, 0.0 }
 0x235   :  { %v1912_v8 = vadd.f32 %v1262_v23, %v2612_v46  ;;  %v1264_v27 = vpop.f32.mrb[62].mxu0  ;;  %v1459_v32 = vpop.f32.mrb[94].mxu1  ;;  %v1639_v9 = vadd.f32 %v1638_v29, %v1637_v16  ;;  %v1642_v63 = vadd.f32 %v1568_v58, %v1567_v1 }
 0x236   :  { %v1505_v36 = vmax.f32 %v1911_v19, 0.0  ;;  %v1507_v38 = vmax.f32 %v1457_v20, 0.0  ;;  %v1913_v59 = vadd.f32 %v1264_v27, %v2606_v43  ;;  %v1460_v39 = vadd.f32 %v1459_v32, %v1363_v28  ;;  %v1266_v40 = vpop.f32.mrb[63].mxu0  ;;  %v1461_v45 = vpop.f32.mrb[95].mxu1 }
 0x237   :  { %v1506_v14 = vmax.f32 %v1912_v8, 0.0  ;;  %v1914_v41 = vadd.f32 %v1266_v40, %v2612_v46  ;;  %1640 = vadd.xlane.f32.xlu0 %v1639_v9  ;;  %v1644_v42 = vadd.f32 %v1643_v35, %v1642_v63 }
 0x238   :  { %v1570_v48 = vmul.f32 %v2616_v50, %v1505_v36  ;;  %v1572_v49 = vmul.f32 %v2621_v30, %v1507_v38  ;;  %v1508_v51 = vmax.f32 %v1913_v59, 0.0  ;;  %v1510_v52 = vmax.f32 %v1460_v39, 0.0 }
 0x239   :  { %v1571_v53 = vmul.f32 %v2625_v44, %v1506_v14  ;;  %v1509_v54 = vmax.f32 %v1914_v41, 0.0  ;;  %1645 = vadd.xlane.f32.xlu1 %v1644_v42 }
 0x23a   :  { %v1573_v43 = vmul.f32 %v2616_v50, %v1508_v51  ;;  %v1575_v37 = vmul.f32 %v2621_v30, %v1510_v52  ;;  %v1648_v46 = vsel %vm1577_vm2, %v1572_v49, 0.0 }
 0x23b   :  { %v1574_v55 = vmul.f32 %v2625_v44, %v1509_v54  ;;  %v1647_v25 = vadd.f32 %v1571_v53, %v1570_v48 }
 0x23c   :  { %v1653_v3 = vsel %vm1577_vm2, %v1575_v37, 0.0 }
 0x23d   :  { %v1649_v18 = vadd.f32 %v1648_v46, %v1647_v25  ;;  %v1652_v10 = vadd.f32 %v1574_v55, %v1573_v43 }
 0x23f   :  { %1650 = vadd.xlane.f32.xlu0 %v1649_v18  ;;  %v1654_v22 = vadd.f32 %v1653_v3, %v1652_v10 }
 0x241   :  { %1655 = vadd.xlane.f32.xlu1 %v1654_v22 }
 0x294   :  { %v1581_v50 = vpop.xlane.xlu0 %1580 }
 0x295   :  { %v1659_v5 = vadd.f32 %v1658_v31, %v1581_v50 }
 0x297   :  { %1676 = vst.msk [vmem:[%s2823_s7] sm:$0xff] %vm1675_vm3, %v1659_v5 }
 0x298   :  { %v1586_v30 = vpop.xlane.xlu0 %1585 }
 0x299   :  { %v1660_v44 = vadd.f32 %v1658_v31, %v1586_v30 }
 0x29b   :  { %1677 = vst.msk [vmem:[%s2823_s7 + $0x8] sm:$0xff] %vm1675_vm3, %v1660_v44 }
 0x29c   :  { %v1591_v26 = vpop.xlane.xlu1 %1590 }
 0x29d   :  { %v1661_v62 = vadd.f32 %v1658_v31, %v1591_v26 }
 0x29f   :  { %1678 = vst.msk [vmem:[%s2823_s7 + $0x10] sm:$0xff] %vm1675_vm3, %v1661_v62 }
 0x2a0   :  { %v1596_v4 = vpop.xlane.xlu1 %1595 }
 0x2a1   :  { %v1662_v34 = vadd.f32 %v1658_v31, %v1596_v4 }
 0x2a3   :  { %1679 = vst.msk [vmem:[%s2823_s7 + $0x18] sm:$0xff] %vm1675_vm3, %v1662_v34 }
 0x2a4   :  { %v1601_v56 = vpop.xlane.xlu0 %1600 }
 0x2a5   :  { %v1663_v57 = vadd.f32 %v1658_v31, %v1601_v56 }
 0x2a6   :  { %v1606_v60 = vpop.xlane.xlu1 %1605 }
 0x2a7   :  { %1680 = vst.msk [vmem:[%s2823_s7 + $0x20] sm:$0xff] %vm1675_vm3, %v1663_v57  ;;  %v1664_v47 = vadd.f32 %v1658_v31, %v1606_v60 }
 0x2a9   :  { %1681 = vst.msk [vmem:[%s2823_s7 + $0x28] sm:$0xff] %vm1675_vm3, %v1664_v47 }
 0x2ac   :  { %v1611_v33 = vpop.xlane.xlu0 %1610 }
 0x2ad   :  { %v1665_v17 = vadd.f32 %v1658_v31, %v1611_v33 }
 0x2ae   :  { %v1616_v61 = vpop.xlane.xlu1 %1615 }
 0x2af   :  { %1682 = vst.msk [vmem:[%s2823_s7 + $0x30] sm:$0xff] %vm1675_vm3, %v1665_v17  ;;  %v1666_v0 = vadd.f32 %v1658_v31, %v1616_v61 }
 0x2b1   :  { %1683 = vst.msk [vmem:[%s2823_s7 + $0x38] sm:$0xff] %vm1675_vm3, %v1666_v0 }
 0x2b4   :  { %v1621_v2 = vpop.xlane.xlu0 %1620 }
 0x2b5   :  { %v1667_v7 = vadd.f32 %v1658_v31, %v1621_v2 }
 0x2b6   :  { %v1626_v11 = vpop.xlane.xlu1 %1625 }
 0x2b7   :  { %1684 = vst.msk [vmem:[%s2823_s7 + $0x40] sm:$0xff] %vm1675_vm3, %v1667_v7  ;;  %v1668_v6 = vadd.f32 %v1658_v31, %v1626_v11 }
 0x2b9   :  { %1685 = vst.msk [vmem:[%s2823_s7 + $0x48] sm:$0xff] %vm1675_vm3, %v1668_v6 }
 0x2bc   :  { %v1631_v1 = vpop.xlane.xlu0 %1630 }
 0x2bd   :  { %v1669_v12 = vadd.f32 %v1658_v31, %v1631_v1 }
 0x2be   :  { %v1636_v13 = vpop.xlane.xlu1 %1635 }
 0x2bf   :  { %1686 = vst.msk [vmem:[%s2823_s7 + $0x50] sm:$0xff] %vm1675_vm3, %v1669_v12  ;;  %v1670_v58 = vadd.f32 %v1658_v31, %v1636_v13 }
 0x2c1   :  { %1687 = vst.msk [vmem:[%s2823_s7 + $0x58] sm:$0xff] %vm1675_vm3, %v1670_v58 }
 0x2c4   :  { %v1641_v21 = vpop.xlane.xlu0 %1640 }
 0x2c5   :  { %v1671_v15 = vadd.f32 %v1658_v31, %v1641_v21 }
 0x2c6   :  { %v1646_v16 = vpop.xlane.xlu1 %1645 }
 0x2c7   :  { %1688 = vst.msk [vmem:[%s2823_s7 + $0x60] sm:$0xff] %vm1675_vm3, %v1671_v15  ;;  %v1672_v19 = vadd.f32 %v1658_v31, %v1646_v16 }
 0x2c9   :  { %1689 = vst.msk [vmem:[%s2823_s7 + $0x68] sm:$0xff] %vm1675_vm3, %v1672_v19 }
 0x2cc   :  { %v1651_v20 = vpop.xlane.xlu0 %1650 }
 0x2cd   :  { %v1673_v23 = vadd.f32 %v1658_v31, %v1651_v20 }
 0x2ce   :  { %v1656_v24 = vpop.xlane.xlu1 %1655 }
 0x2cf   :  { %1690 = vst.msk [vmem:[%s2823_s7 + $0x70] sm:$0xff] %vm1675_vm3, %v1673_v23  ;;  %v1674_v28 = vadd.f32 %v1658_v31, %v1656_v24 }
 0x2d1   :  { %1691 = vst.msk [vmem:[%s2823_s7 + $0x78] sm:$0xff] %vm1675_vm3, %v1674_v28 }

</bundles_post_ra>
